<compile_context>
chip_gen: v7x
topology: tpu7x:2x2x1
jax: 0.10.0
libtpu: 0.0.40
codegen_flags: <defaults>
</compile_context>

<pallas_src>
import functools

import jax
import jax.numpy as jnp
from jax.experimental import pallas as pl
from jax.experimental.pallas import tpu as pltpu


# ----------------------------------------------------------------------------
# Pallas kernel: MLP + normalize + fused classifiers + log-softmax fusion.
# Runs once per batch tile of TB rows; all weights stay resident in VMEM.
# ----------------------------------------------------------------------------
def _czsl_val_kernel(num_pairs,
                     eta_ref,             # (1, 1)      f32   SMEM scalar
                     feat_ref,            # (TB, C)     f32   pooled image feature tile
                     w1_ref, b1_ref,      # (C, H) bf16, (1, H)  f32
                     w2_ref, b2_ref,      # (H, E) bf16, (1, E)  f32
                     pyy_t_ref,           # (E, Pp)     bf16  Py(attrs,objs)^T (padded)
                     a_so_ref,            # (C, 2*Pp)   bf16  [Ws@Ps^T | Wo@Po^T] folded
                     c_so_ref,            # (1, 2*Pp)   f32   [bs@Ps^T | bo@Po^T] folded
                     score_ref):          # (TB, Pp)    f32   output tile
    f32 = jnp.float32
    eta = eta_ref[0, 0]

    feat = feat_ref[...]                                        # (TB, C) f32
    tb, pp = score_ref.shape

    # --- feats_so = F.normalize(feat, dim=-1)  (f32, rsqrt on EUP) ----------
    so_inv = jax.lax.rsqrt(
        jnp.maximum(jnp.sum(feat * feat, axis=-1, keepdims=True), 1e-24))
    xso = feat * so_inv

    # --- feats_y = F.normalize(image_embedder(feat), dim=1) ----------------
    h = jnp.dot(feat.astype(w1_ref.dtype), w1_ref[...],
                preferred_element_type=f32) + b1_ref[...]
    h = jnp.maximum(h, 0.0)                                     # ReLU (f32)
    xy = jnp.dot(h.astype(w2_ref.dtype), w2_ref[...],
                 preferred_element_type=f32) + b2_ref[...]
    xy_inv = jax.lax.rsqrt(
        jnp.maximum(jnp.sum(xy * xy, axis=-1, keepdims=True), 1e-24))
    xy = xy * xy_inv

    # --- classifier logits ---------------------------------------------------
    # pred_y = xy @ Py^T
    pred_y = jnp.dot(xy.astype(pyy_t_ref.dtype), pyy_t_ref[...],
                     preferred_element_type=f32)                # (TB, Pp)
    # ls|lo in ONE matmul: xso @ [Ws@Ps^T | Wo@Po^T] + [bs@Ps^T | bo@Po^T]
    lslo = jnp.dot(xso.astype(a_so_ref.dtype), a_so_ref[...],
                   preferred_element_type=f32) + c_so_ref[...]  # (TB, 2*Pp)
    ls = lslo[:, :pp]
    lo = lslo[:, pp:]

    # --- mask padded pair columns -------------------------------------------
    col = jax.lax.broadcasted_iota(jnp.int32, (tb, pp), 1)
    valid = col < num_pairs
    neg = jnp.float32(-1e30)
    ls = jnp.where(valid, ls, neg)
    lo = jnp.where(valid, lo, neg)

    # --- log(softmax(ls)*softmax(lo)) == log_softmax(ls)+log_softmax(lo) -----
    def _log_softmax(z):
        m = jnp.max(z, axis=-1, keepdims=True)
        lse = m + jnp.log(jnp.sum(jnp.exp(z - m), axis=-1, keepdims=True))
        return z - lse

    s = pred_y + eta * (_log_softmax(ls) + _log_softmax(lo))
    s = jnp.where(valid, s, neg)

    # --- final softmax (EUP reciprocal) --------------------------------------
    s = s - jnp.max(s, axis=-1, keepdims=True)
    e = jnp.exp(s)
    denom = jnp.sum(e, axis=-1, keepdims=True)
    score_ref[...] = e * pl.reciprocal(denom, approx=True)


# ----------------------------------------------------------------------------
# Wrapper: pool, pad, tile, call.
# ----------------------------------------------------------------------------
def czsl_val_forward(img_nchw, params, eta, *, batch_tile=128):
    """img_nchw: (B, C, 7, 7) -> softmax scores over pairs, shape (B, P)."""
    B, C = img_nchw.shape[0], img_nchw.shape[1]

    # F.avg_pool2d(kernel_size=7).view(B, feat_dim): global mean over 7x7.
    # Done in plain JAX so the kernel only DMAs the 49x-smaller pooled feature.
    feat = jnp.mean(img_nchw.astype(jnp.float32), axis=(2, 3))   # (B, C)

    TB = batch_tile
    Bp = ((B + TB - 1) // TB) * TB
    if Bp != B:
        feat = jnp.pad(feat, ((0, Bp - B), (0, 0)))

    P = params["num_pairs"]
    Pp = params["pyy_t"].shape[1]        # pair dim padded to multiple of 128
    eta_arr = jnp.full((1, 1), eta, dtype=jnp.float32)

    def const_spec(arr):                 # weight: full block, constant index
        nd = arr.ndim
        return pl.BlockSpec(arr.shape, lambda i, _nd=nd: (0,) * _nd)

    weights = (params["w1"], params["b1"], params["w2"], params["b2"],
               params["pyy_t"], params["a_so"], params["c_so"])

    out = pl.pallas_call(
        functools.partial(_czsl_val_kernel, P),
        out_shape=jax.ShapeDtypeStruct((Bp, Pp), jnp.float32),
        grid=(Bp // TB,),
        in_specs=[
            pl.BlockSpec(memory_space=pltpu.MemorySpace.SMEM),   # eta scalar
            pl.BlockSpec((TB, C), lambda i: (i, 0)),             # feat tile
            *[const_spec(w) for w in weights],                   # resident weights
        ],
        out_specs=pl.BlockSpec((TB, Pp), lambda i: (i, 0)),      # lane-dense output
        compiler_params=pltpu.CompilerParams(
            dimension_semantics=("parallel",),
            vmem_limit_bytes=48 * 1024 * 1024,
        ),
    )(eta_arr, feat, *weights)

    return out[:B, :P]


# ----------------------------------------------------------------------------
# Deterministic synthetic parameter construction (plain-JAX, one-time).
# ----------------------------------------------------------------------------
def build_params(key, *, feat_dim, hidden, emb_dim, word_dim,
                 num_attrs, num_objs, num_pairs, pair_pad=128):
    keys = jax.random.split(key, 16)
    k = iter(keys)

    def rnd(shape, scale=0.1):
        return (scale * jax.random.normal(next(k), shape)).astype(jnp.float32)

    # image_embedder MLP: Linear(feat,hidden) -> ReLU -> Linear(hidden,emb)
    w1, b1 = rnd((feat_dim, hidden)), rnd((1, hidden))
    w2, b2 = rnd((hidden, emb_dim)), rnd((1, emb_dim))
    # _Vs_Vo: two linear heads on the normalized image feature
    ws, bs = rnd((feat_dim, emb_dim)), rnd((1, emb_dim))
    wo, bo = rnd((feat_dim, emb_dim)), rnd((1, emb_dim))

    # pair list: (attr_idx, obj_idx) per pair
    attr_ids = jax.random.randint(next(k), (num_pairs,), 0, num_attrs)
    obj_ids = jax.random.randint(next(k), (num_pairs,), 0, num_objs)

    # _Py / _Ps_Po: embedding tables + linear compositions (synthesized)
    attr_emb = rnd((num_attrs, word_dim))
    obj_emb = rnd((num_objs, word_dim))
    wp_y = rnd((2 * word_dim, emb_dim))
    wp_s = rnd((word_dim, emb_dim))
    wp_o = rnd((word_dim, emb_dim))

    a_sel = attr_emb[attr_ids]                             # (P, word)
    o_sel = obj_emb[obj_ids]                               # (P, word)
    pyy = jnp.concatenate([a_sel, o_sel], axis=-1) @ wp_y  # (P, E)
    pss = a_sel @ wp_s                                     # (P, E)
    poo = o_sel @ wp_o                                     # (P, E)

    # Pad pair dimension to a multiple of 128 (lane-dense output).
    Pp = ((num_pairs + pair_pad - 1) // pair_pad) * pair_pad
    pad = Pp - num_pairs

    def pad_p(m):
        return jnp.pad(m, ((0, 0), (0, pad)))

    pyy_t = pad_p(pyy.T)                                   # (E, Pp)
    # Fold Vs->Ps and Vo->Po linear chains: ls = xso@(Ws@Ps^T) + bs@Ps^T, etc.
    a_s, c_s = pad_p(ws @ pss.T), pad_p(bs @ pss.T)        # (C, Pp), (1, Pp)
    a_o, c_o = pad_p(wo @ poo.T), pad_p(bo @ poo.T)        # (C, Pp), (1, Pp)

    return {
        "num_pairs": num_pairs,
        # bf16 weight storage (f32 accumulation inside the kernel)
        "w1": w1.astype(jnp.bfloat16), "b1": b1,
        "w2": w2.astype(jnp.bfloat16), "b2": b2,
        "pyy_t": pyy_t.astype(jnp.bfloat16),
        "a_so": jnp.concatenate([a_s, a_o], axis=1).astype(jnp.bfloat16),
        "c_so": jnp.concatenate([c_s, c_o], axis=1).astype(jnp.float32),
    }


if __name__ == "__main__":
    key = jax.random.PRNGKey(0)
    k_img, k_par = jax.random.split(key)

    B, C, SP = 2, 32, 7          # batch, feat_dim (channels), spatial (7x7)
    hidden, emb_dim, word_dim = 64, 32, 16
    num_attrs, num_objs, num_pairs = 4, 5, 16
    eta = 0.5

    img = jax.random.normal(k_img, (B, C, SP, SP), dtype=jnp.float32)  # NCHW
    params = build_params(k_par, feat_dim=C, hidden=hidden, emb_dim=emb_dim,
                          word_dim=word_dim, num_attrs=num_attrs,
                          num_objs=num_objs, num_pairs=num_pairs)

    scores = czsl_val_forward(img, params, eta)
    scores = jax.block_until_ready(scores)

    assert scores.shape == (B, num_pairs)
    assert bool(jnp.all(jnp.isfinite(scores)))
    row_sums = jnp.sum(scores, axis=-1)
    assert bool(jnp.all(jnp.abs(row_sums - 1.0) < 2e-2))
    print("KERNEL_OK")
</pallas_src>

<mosaic_0001>
module attributes {stable_mosaic.version = 11 : i64} {
  func.func @_czsl_val_kernel(%arg0: i32, %arg1: memref<1x1xf32, #tpu.memory_space<smem>>, %arg2: memref<128x32xf32, #tpu.memory_space<vmem>>, %arg3: memref<32x64xbf16, #tpu.memory_space<vmem>>, %arg4: memref<1x64xf32, #tpu.memory_space<vmem>>, %arg5: memref<64x32xbf16, #tpu.memory_space<vmem>>, %arg6: memref<1x32xf32, #tpu.memory_space<vmem>>, %arg7: memref<32x128xbf16, #tpu.memory_space<vmem>>, %arg8: memref<32x256xbf16, #tpu.memory_space<vmem>>, %arg9: memref<1x256xf32, #tpu.memory_space<vmem>>, %arg10: memref<128x128xf32, #tpu.memory_space<vmem>>) attributes {dimension_semantics = [#tpu.dimension_semantics<parallel>], iteration_bounds = array<i64: 1>, scalar_prefetch = 0 : i64, scratch_operands = 0 : i64, tpu.core_type = #tpu.core_type<tc>, window_params = [{transform_indices = @transform_0, window_bounds = array<i64: 1, 1>}, {transform_indices = @transform_1, window_bounds = array<i64: 128, 32>}, {pipeline_mode = #tpu.pipeline_mode<synchronous>, transform_indices = @transform_2, window_bounds = array<i64: 32, 64>}, {pipeline_mode = #tpu.pipeline_mode<synchronous>, transform_indices = @transform_3, window_bounds = array<i64: 1, 64>}, {pipeline_mode = #tpu.pipeline_mode<synchronous>, transform_indices = @transform_4, window_bounds = array<i64: 64, 32>}, {pipeline_mode = #tpu.pipeline_mode<synchronous>, transform_indices = @transform_5, window_bounds = array<i64: 1, 32>}, {pipeline_mode = #tpu.pipeline_mode<synchronous>, transform_indices = @transform_6, window_bounds = array<i64: 32, 128>}, {pipeline_mode = #tpu.pipeline_mode<synchronous>, transform_indices = @transform_7, window_bounds = array<i64: 32, 256>}, {pipeline_mode = #tpu.pipeline_mode<synchronous>, transform_indices = @transform_8, window_bounds = array<i64: 1, 256>}, {transform_indices = @transform_9, window_bounds = array<i64: 128, 128>}]} {
    %c0 = arith.constant 0 : index
    %c0_0 = arith.constant 0 : index
    %0 = memref.load %arg1[%c0, %c0_0] : memref<1x1xf32, #tpu.memory_space<smem>>
    %c0_1 = arith.constant 0 : index
    %c0_2 = arith.constant 0 : index
    %1 = vector.load %arg2[%c0_1, %c0_2] : memref<128x32xf32, #tpu.memory_space<vmem>>, vector<128x32xf32>
    %2 = arith.mulf %1, %1 : vector<128x32xf32>
    %cst = arith.constant dense<0.000000e+00> : vector<128xf32>
    %3 = vector.multi_reduction <add>, %2, %cst [1] : vector<128x32xf32> to vector<128xf32>
    %4 = vector.shape_cast %3 : vector<128xf32> to vector<128x1xf32>
    %cst_3 = arith.constant 1.000000e-24 : f32
    %5 = vector.broadcast %cst_3 : f32 to vector<128x1xf32>
    %6 = arith.maximumf %4, %5 : vector<128x1xf32>
    %7 = math.rsqrt %6 : vector<128x1xf32>
    %8 = vector.broadcast %7 : vector<128x1xf32> to vector<128x32xf32>
    %9 = arith.mulf %1, %8 : vector<128x32xf32>
    %10 = arith.truncf %1 : vector<128x32xf32> to vector<128x32xbf16>
    %c0_4 = arith.constant 0 : index
    %c0_5 = arith.constant 0 : index
    %11 = vector.load %arg3[%c0_4, %c0_5] : memref<32x64xbf16, #tpu.memory_space<vmem>>, vector<32x64xbf16>
    %cst_6 = arith.constant dense<0.000000e+00> : vector<128x64xf32>
    %12 = tpu.matmul %10, %11, %cst_6 {dimension_numbers = #tpu.dot_dimension_numbers<[1], [0], [0], [1], [0, 0, 1, 1], [], []>} : vector<128x32xbf16>, vector<32x64xbf16>, vector<128x64xf32> -> vector<128x64xf32>
    %c0_7 = arith.constant 0 : index
    %c0_8 = arith.constant 0 : index
    %13 = vector.load %arg4[%c0_7, %c0_8] : memref<1x64xf32, #tpu.memory_space<vmem>>, vector<1x64xf32>
    %14 = vector.broadcast %13 : vector<1x64xf32> to vector<128x64xf32>
    %15 = arith.addf %12, %14 : vector<128x64xf32>
    %cst_9 = arith.constant 0.000000e+00 : f32
    %16 = vector.broadcast %cst_9 : f32 to vector<128x64xf32>
    %17 = arith.maximumf %15, %16 : vector<128x64xf32>
    %18 = arith.truncf %17 : vector<128x64xf32> to vector<128x64xbf16>
    %c0_10 = arith.constant 0 : index
    %c0_11 = arith.constant 0 : index
    %19 = vector.load %arg5[%c0_10, %c0_11] : memref<64x32xbf16, #tpu.memory_space<vmem>>, vector<64x32xbf16>
    %cst_12 = arith.constant dense<0.000000e+00> : vector<128x32xf32>
    %20 = tpu.matmul %18, %19, %cst_12 {dimension_numbers = #tpu.dot_dimension_numbers<[1], [0], [0], [1], [0, 0, 1, 1], [], []>} : vector<128x64xbf16>, vector<64x32xbf16>, vector<128x32xf32> -> vector<128x32xf32>
    %c0_13 = arith.constant 0 : index
    %c0_14 = arith.constant 0 : index
    %21 = vector.load %arg6[%c0_13, %c0_14] : memref<1x32xf32, #tpu.memory_space<vmem>>, vector<1x32xf32>
    %22 = vector.broadcast %21 : vector<1x32xf32> to vector<128x32xf32>
    %23 = arith.addf %20, %22 : vector<128x32xf32>
    %24 = arith.mulf %23, %23 : vector<128x32xf32>
    %cst_15 = arith.constant dense<0.000000e+00> : vector<128xf32>
    %25 = vector.multi_reduction <add>, %24, %cst_15 [1] : vector<128x32xf32> to vector<128xf32>
    %26 = vector.shape_cast %25 : vector<128xf32> to vector<128x1xf32>
    %cst_16 = arith.constant 1.000000e-24 : f32
    %27 = vector.broadcast %cst_16 : f32 to vector<128x1xf32>
    %28 = arith.maximumf %26, %27 : vector<128x1xf32>
    %29 = math.rsqrt %28 : vector<128x1xf32>
    %30 = vector.broadcast %29 : vector<128x1xf32> to vector<128x32xf32>
    %31 = arith.mulf %23, %30 : vector<128x32xf32>
    %32 = arith.truncf %31 : vector<128x32xf32> to vector<128x32xbf16>
    %c0_17 = arith.constant 0 : index
    %c0_18 = arith.constant 0 : index
    %33 = vector.load %arg7[%c0_17, %c0_18] : memref<32x128xbf16, #tpu.memory_space<vmem>>, vector<32x128xbf16>
    %cst_19 = arith.constant dense<0.000000e+00> : vector<128x128xf32>
    %34 = tpu.matmul %32, %33, %cst_19 {dimension_numbers = #tpu.dot_dimension_numbers<[1], [0], [0], [1], [0, 0, 1, 1], [], []>} : vector<128x32xbf16>, vector<32x128xbf16>, vector<128x128xf32> -> vector<128x128xf32>
    %35 = arith.truncf %9 : vector<128x32xf32> to vector<128x32xbf16>
    %c0_20 = arith.constant 0 : index
    %c0_21 = arith.constant 0 : index
    %36 = vector.load %arg8[%c0_20, %c0_21] : memref<32x256xbf16, #tpu.memory_space<vmem>>, vector<32x256xbf16>
    %cst_22 = arith.constant dense<0.000000e+00> : vector<128x256xf32>
    %37 = tpu.matmul %35, %36, %cst_22 {dimension_numbers = #tpu.dot_dimension_numbers<[1], [0], [0], [1], [0, 0, 1, 1], [], []>} : vector<128x32xbf16>, vector<32x256xbf16>, vector<128x256xf32> -> vector<128x256xf32>
    %c0_23 = arith.constant 0 : index
    %c0_24 = arith.constant 0 : index
    %38 = vector.load %arg9[%c0_23, %c0_24] : memref<1x256xf32, #tpu.memory_space<vmem>>, vector<1x256xf32>
    %39 = vector.broadcast %38 : vector<1x256xf32> to vector<128x256xf32>
    %40 = arith.addf %37, %39 : vector<128x256xf32>
    %41 = vector.extract_strided_slice %40 {offsets = [0, 0], sizes = [128, 128], strides = [1, 1]} : vector<128x256xf32> to vector<128x128xf32>
    %42 = vector.extract_strided_slice %40 {offsets = [0, 128], sizes = [128, 128], strides = [1, 1]} : vector<128x256xf32> to vector<128x128xf32>
    %43 = tpu.iota {dimensions = array<i32: 1>} : vector<128x128xi32>
    %c16_i32 = arith.constant 16 : i32
    %44 = vector.broadcast %c16_i32 : i32 to vector<128x128xi32>
    %45 = arith.cmpi slt, %43, %44 : vector<128x128xi32>
    %cst_25 = arith.constant -1.000000e+30 : f32
    %46 = vector.broadcast %cst_25 : f32 to vector<128x128xf32>
    %47 = arith.select %45, %41, %46 : vector<128x128xi1>, vector<128x128xf32>
    %cst_26 = arith.constant -1.000000e+30 : f32
    %48 = vector.broadcast %cst_26 : f32 to vector<128x128xf32>
    %49 = arith.select %45, %42, %48 : vector<128x128xi1>, vector<128x128xf32>
    %cst_27 = arith.constant dense<0xFF800000> : vector<128xf32>
    %50 = vector.multi_reduction <maximumf>, %47, %cst_27 [1] : vector<128x128xf32> to vector<128xf32>
    %51 = vector.shape_cast %50 : vector<128xf32> to vector<128x1xf32>
    %52 = vector.broadcast %51 : vector<128x1xf32> to vector<128x128xf32>
    %53 = arith.subf %47, %52 : vector<128x128xf32>
    %54 = math.exp %53 : vector<128x128xf32>
    %cst_28 = arith.constant dense<0.000000e+00> : vector<128xf32>
    %55 = vector.multi_reduction <add>, %54, %cst_28 [1] : vector<128x128xf32> to vector<128xf32>
    %56 = vector.shape_cast %55 : vector<128xf32> to vector<128x1xf32>
    %57 = math.log %56 : vector<128x1xf32>
    %58 = arith.addf %51, %57 : vector<128x1xf32>
    %59 = vector.broadcast %58 : vector<128x1xf32> to vector<128x128xf32>
    %60 = arith.subf %47, %59 : vector<128x128xf32>
    %cst_29 = arith.constant dense<0xFF800000> : vector<128xf32>
    %61 = vector.multi_reduction <maximumf>, %49, %cst_29 [1] : vector<128x128xf32> to vector<128xf32>
    %62 = vector.shape_cast %61 : vector<128xf32> to vector<128x1xf32>
    %63 = vector.broadcast %62 : vector<128x1xf32> to vector<128x128xf32>
    %64 = arith.subf %49, %63 : vector<128x128xf32>
    %65 = math.exp %64 : vector<128x128xf32>
    %cst_30 = arith.constant dense<0.000000e+00> : vector<128xf32>
    %66 = vector.multi_reduction <add>, %65, %cst_30 [1] : vector<128x128xf32> to vector<128xf32>
    %67 = vector.shape_cast %66 : vector<128xf32> to vector<128x1xf32>
    %68 = math.log %67 : vector<128x1xf32>
    %69 = arith.addf %62, %68 : vector<128x1xf32>
    %70 = vector.broadcast %69 : vector<128x1xf32> to vector<128x128xf32>
    %71 = arith.subf %49, %70 : vector<128x128xf32>
    %72 = arith.addf %60, %71 : vector<128x128xf32>
    %73 = vector.broadcast %0 : f32 to vector<128x128xf32>
    %74 = arith.mulf %73, %72 : vector<128x128xf32>
    %75 = arith.addf %34, %74 : vector<128x128xf32>
    %cst_31 = arith.constant -1.000000e+30 : f32
    %76 = vector.broadcast %cst_31 : f32 to vector<128x128xf32>
    %77 = arith.select %45, %75, %76 : vector<128x128xi1>, vector<128x128xf32>
    %cst_32 = arith.constant dense<0xFF800000> : vector<128xf32>
    %78 = vector.multi_reduction <maximumf>, %77, %cst_32 [1] : vector<128x128xf32> to vector<128xf32>
    %79 = vector.shape_cast %78 : vector<128xf32> to vector<128x1xf32>
    %80 = vector.broadcast %79 : vector<128x1xf32> to vector<128x128xf32>
    %81 = arith.subf %77, %80 : vector<128x128xf32>
    %82 = math.exp %81 : vector<128x128xf32>
    %cst_33 = arith.constant dense<0.000000e+00> : vector<128xf32>
    %83 = vector.multi_reduction <add>, %82, %cst_33 [1] : vector<128x128xf32> to vector<128xf32>
    %84 = vector.shape_cast %83 : vector<128xf32> to vector<128x1xf32>
    %85 = tpu.reciprocal %84 {approx = true} : vector<128x1xf32> -> vector<128x1xf32>
    %86 = vector.broadcast %85 : vector<128x1xf32> to vector<128x128xf32>
    %87 = arith.mulf %82, %86 : vector<128x128xf32>
    %c0_34 = arith.constant 0 : index
    %c0_35 = arith.constant 0 : index
    %88 = vector.load %arg10[%c0_34, %c0_35] : memref<128x128xf32, #tpu.memory_space<vmem>>, vector<128x128xf32>
    tpu.vector_store %arg10[%c0_34, %c0_35], %87 {strides = array<i32>} : memref<128x128xf32, #tpu.memory_space<vmem>>, vector<128x128xf32>,
    return
  }
  func.func @transform_0(%arg0: i32) -> (i32, i32) {
    %c0_i32 = arith.constant 0 : i32
    %c0_i32_0 = arith.constant 0 : i32
    %c0_i32_1 = arith.constant 0 : i32
    return %c0_i32, %c0_i32_0 : i32, i32
  }
  func.func @transform_1(%arg0: i32) -> (i32, i32) {
    %c0_i32 = arith.constant 0 : i32
    %c0_i32_0 = arith.constant 0 : i32
    return %arg0, %c0_i32 : i32, i32
  }
  func.func @transform_2(%arg0: i32) -> (i32, i32) {
    %c0_i32 = arith.constant 0 : i32
    %c0_i32_0 = arith.constant 0 : i32
    %c0_i32_1 = arith.constant 0 : i32
    return %c0_i32, %c0_i32_0 : i32, i32
  }
  func.func @transform_3(%arg0: i32) -> (i32, i32) {
    %c0_i32 = arith.constant 0 : i32
    %c0_i32_0 = arith.constant 0 : i32
    %c0_i32_1 = arith.constant 0 : i32
    return %c0_i32, %c0_i32_0 : i32, i32
  }
  func.func @transform_4(%arg0: i32) -> (i32, i32) {
    %c0_i32 = arith.constant 0 : i32
    %c0_i32_0 = arith.constant 0 : i32
    %c0_i32_1 = arith.constant 0 : i32
    return %c0_i32, %c0_i32_0 : i32, i32
  }
  func.func @transform_5(%arg0: i32) -> (i32, i32) {
    %c0_i32 = arith.constant 0 : i32
    %c0_i32_0 = arith.constant 0 : i32
    %c0_i32_1 = arith.constant 0 : i32
    return %c0_i32, %c0_i32_0 : i32, i32
  }
  func.func @transform_6(%arg0: i32) -> (i32, i32) {
    %c0_i32 = arith.constant 0 : i32
    %c0_i32_0 = arith.constant 0 : i32
    %c0_i32_1 = arith.constant 0 : i32
    return %c0_i32, %c0_i32_0 : i32, i32
  }
  func.func @transform_7(%arg0: i32) -> (i32, i32) {
    %c0_i32 = arith.constant 0 : i32
    %c0_i32_0 = arith.constant 0 : i32
    %c0_i32_1 = arith.constant 0 : i32
    return %c0_i32, %c0_i32_0 : i32, i32
  }
  func.func @transform_8(%arg0: i32) -> (i32, i32) {
    %c0_i32 = arith.constant 0 : i32
    %c0_i32_0 = arith.constant 0 : i32
    %c0_i32_1 = arith.constant 0 : i32
    return %c0_i32, %c0_i32_0 : i32, i32
  }
  func.func @transform_9(%arg0: i32) -> (i32, i32) {
    %c0_i32 = arith.constant 0 : i32
    %c0_i32_0 = arith.constant 0 : i32
    return %arg0, %c0_i32 : i32, i32
  }
}

</mosaic_0001>

<bundles_post_ra>
// kernel: tpu_custom_call.1
= control target key start
LH: loop header
LB: loop body
LE: loop exit
PB: predicated region body
PF: predicated region fallthrough
CT: control target
= control target key end

     0   :  { %vm68_vm0 = vcmask 261120   ;;  %s3127_s0 = inlined_call_operand.<no memory space> [shape: f32[1,1], index: 0, kind: input, shape index: {}]   ;;  %s3128_s1 = inlined_call_operand.vmem [shape: f32[128,32], index: 1, kind: input, shape index: {}]   ;;  %s3129_s2 = inlined_call_operand.vmem [shape: bf16[32,64], index: 2, kind: input, shape index: {}]   ;;  %s3130_s3 = inlined_call_operand.vmem [shape: f32[1,64], index: 3, kind: input, shape index: {}]   ;;  %s3131_s4 = inlined_call_operand.vmem [shape: bf16[64,32], index: 4, kind: input, shape index: {}]   ;;  %s3132_s5 = inlined_call_operand.vmem [shape: f32[1,32], index: 5, kind: input, shape index: {}]   ;;  %s3133_s6 = inlined_call_operand.vmem [shape: bf16[32,128], index: 6, kind: input, shape index: {}]   ;;  %s3134_s7 = inlined_call_operand.vmem [shape: bf16[32,256], index: 7, kind: input, shape index: {}]   ;;  %s3135_s8 = inlined_call_operand.vmem [shape: f32[1,256], index: 8, kind: input, shape index: {}]   ;;  %s3136_s9 = inlined_call_operand.hbm [shape: f32[128,128], index: 9, kind: output, shape index: {}]  }
   0x1   :  { %v1702_v0 = vld [vmem:[%s3129_s2] sm:$0xff]   ;;  %v1703_v1 = vld [vmem:[%s3129_s2 + $0x8] sm:$0xff]   ;;  %v2071_v5 = vld [vmem:[%s3128_s1 + $0x10] sm:$0xff] }
   0x2   :  { %1630 = vmatprep.subr.bf16.mxu0 %v1702_v0  ;;  %v2059_v2 = vld [vmem:[%s3128_s1] sm:$0xff]  ;;  %v2064_v3 = vld [vmem:[%s3128_s1 + $0x8] sm:$0xff]  ;;  %1694 = vmatprep.subr.bf16.mxu1 %v1702_v0  ;;  %v2076_v6 = vld [vmem:[%s3128_s1 + $0x18] sm:$0xff]  ;;  %v54_v11 = vmul.f32 %v2071_v5, %v2071_v5 }
   0x3   :  { %1631 = vmatpush3.bf16.msra.mxu0 %v1702_v0  ;;  %v165_v4 = vpack.c.bf16 %v2064_v3, %v2059_v2  ;;  %1696 = vmatpush3.bf16.msra.mxu1 %v1702_v0  ;;  %v52_v7 = vmul.f32 %v2059_v2, %v2059_v2  ;;  %v2083_v8 = vld [vmem:[%s3128_s1 + $0x20] sm:$0xff]  ;;  %v2088_v9 = vld [vmem:[%s3128_s1 + $0x28] sm:$0xff]  ;;  %v2106_v13 = vld [vmem:[%s3128_s1 + $0x50] sm:$0xff]  ;;  %v53_v16 = vmul.f32 %v2064_v3, %v2064_v3 }
   0x4   :  { %1632 = vmatprep.subr.bf16.mxu0 %v1703_v1  ;;  %1695 = vmatprep.subr.bf16.mxu1 %v1703_v1  ;;  %v2093_v10 = vld [vmem:[%s3128_s1 + $0x40] sm:$0xff]  ;;  %v2101_v12 = vld [vmem:[%s3128_s1 + $0x48] sm:$0xff]  ;;  %v2111_v14 = vld [vmem:[%s3128_s1 + $0x58] sm:$0xff]  ;;  %v55_v17 = vmul.f32 %v2076_v6, %v2076_v6  ;;  %v166_v18 = vpack.c.bf16 %v2076_v6, %v2071_v5  ;;  %v75_v23 = vsel %vm68_vm0, %v54_v11, 0.0  ;;  %v167_v24 = vpack.c.bf16 %v2088_v9, %v2083_v8 }
   0x5   :  { %1634 = vmatprep.mubr.msk.bf16.mxu0 %vm68_vm0, %v165_v4  ;;  %v69_v15 = vsel %vm68_vm0, %v52_v7, 0.0  ;;  %v169_v19 = vpack.c.bf16 %v2101_v12, %v2093_v10  ;;  %v170_v20 = vpack.c.bf16 %v2111_v14, %v2106_v13  ;;  %v2127_v21 = vld [vmem:[%s3128_s1 + $0x60] sm:$0xff]  ;;  %v2132_v22 = vld [vmem:[%s3128_s1 + $0x68] sm:$0xff]  ;;  %76 = vadd.xlane.f32.xlu1 %v75_v23  ;;  %v2143_v26 = vld [vmem:[%s3128_s1 + $0x30] sm:$0xff]  ;;  %v72_v28 = vsel %vm68_vm0, %v53_v16, 0.0 }
   0x6   :  { %70 = vadd.xlane.f32.xlu0 %v69_v15  ;;  %v171_v25 = vpack.c.bf16 %v2132_v22, %v2127_v21  ;;  %v2148_v27 = vld [vmem:[%s3128_s1 + $0x38] sm:$0xff]  ;;  %v78_v29 = vsel %vm68_vm0, %v55_v17, 0.0  ;;  %v57_v30 = vmul.f32 %v2088_v9, %v2088_v9  ;;  %v56_v31 = vmul.f32 %v2083_v8, %v2083_v8  ;;  %v2161_v32 = vld [vmem:[%s3128_s1 + $0x70] sm:$0xff] }
   0x7   :  { %1633 = vmatpush3.bf16.msra.mxu0 %v1703_v1  ;;  %1697 = vmatpush3.bf16.msra.mxu1 %v1703_v1  ;;  %v2168_v33 = vld [vmem:[%s3128_s1 + $0x78] sm:$0xff]  ;;  %v59_v36 = vmul.f32 %v2148_v27, %v2148_v27  ;;  %v58_v37 = vmul.f32 %v2143_v26, %v2143_v26  ;;  %v168_v38 = vpack.c.bf16 %v2148_v27, %v2143_v26 }
   0x8   :  { %1642 = vmatprep.mubr.msk.bf16.mxu1 %vm68_vm0, %v169_v19  ;;  %v84_v34 = vsel %vm68_vm0, %v57_v30, 0.0  ;;  %v81_v35 = vsel %vm68_vm0, %v56_v31, 0.0  ;;  %v172_v39 = vpack.c.bf16 %v2168_v33, %v2161_v32 }
   0x9   :  { %79 = vadd.xlane.f32.xlu1 %v78_v29 }
   0xa   :  { %1635 = vmatmul.mubr.msk.bf16.vlgmr.msra.gmra.mrb[0].mxu0 %vm68_vm0, %v166_v18  ;;  %1643 = vmatmul.mubr.msk.bf16.vlgmr.msra.gmra.mrb[0].mxu1 %vm68_vm0, %v170_v20 }
   0xb   :  { %1638 = vmatprep.mubr.msk.bf16.mxu0 %vm68_vm0, %v167_v24  ;;  %1646 = vmatprep.mubr.msk.bf16.mxu1 %vm68_vm0, %v171_v25 }
   0xc   :  { %73 = vadd.xlane.f32.xlu0 %v72_v28 }
   0xd   :  { %15 = vsyncpa [#allocation4], 0  ;;  %85 = vadd.xlane.f32.xlu1 %v84_v34  ;;  %v90_v40 = vsel %vm68_vm0, %v59_v36, 0.0  ;;  %v87_v41 = vsel %vm68_vm0, %v58_v37, 0.0  ;;  %v61_v42 = vmul.f32 %v2101_v12, %v2101_v12  ;;  %v60_v43 = vmul.f32 %v2093_v10, %v2093_v10  ;;  %v1704_v58 = vld [vmem:[%s3131_s4] sm:$0xff]   ;;  %v1705_v59 = vld [vmem:[%s3131_s4 + $0x8] sm:$0xff]  }
   0xe   :  { %v63_v46 = vmul.f32 %v2111_v14, %v2111_v14  ;;  %v62_v47 = vmul.f32 %v2106_v13, %v2106_v13  ;;  %v65_v50 = vmul.f32 %v2132_v22, %v2132_v22  ;;  %v64_v51 = vmul.f32 %v2127_v21, %v2127_v21  ;;  %1650 = vmatprep.subr.bf16.mxu1 %v1704_v58  ;;  %v1708_v60 = vld [vmem:[%s3134_s7 + $0x4] ss:$8 sps:$4 sm:$0xff]   ;;  %v1709_v61 = vld [vmem:[%s3131_s4 + $0x10] sm:$0xff]   ;;  %v1706_v62 = vld [vmem:[%s3134_s7] ss:$8 sps:$4 sm:$0xff]  }
   0xf   :  { %v96_v44 = vsel %vm68_vm0, %v61_v42, 0.0  ;;  %v93_v45 = vsel %vm68_vm0, %v60_v43, 0.0  ;;  %v67_v54 = vmul.f32 %v2168_v33, %v2168_v33  ;;  %v66_v55 = vmul.f32 %v2161_v32, %v2161_v32  ;;  %1651 = vmatpush3.bf16.msra.mxu1 %v1704_v58  ;;  %694 = vmatprep.subr.bf16.mxu0 %v1708_v60  ;;  %v1710_v63 = vld [vmem:[%s3131_s4 + $0x18] sm:$0xff]  }
  0x10   :  { %82 = vadd.xlane.f32.xlu0 %v81_v35  ;;  %v102_v48 = vsel %vm68_vm0, %v63_v46, 0.0  ;;  %v99_v49 = vsel %vm68_vm0, %v62_v47, 0.0  ;;  %v108_v52 = vsel %vm68_vm0, %v65_v50, 0.0  ;;  %v105_v53 = vsel %vm68_vm0, %v64_v51, 0.0  ;;  %1652 = vmatprep.subr.bf16.mxu1 %v1705_v59  ;;  %v1713_v0 = vld [vmem:[%s3134_s7 + $0x14] ss:$8 sps:$4 sm:$0xff]  }
  0x11   :  { %91 = vadd.xlane.f32.xlu1 %v90_v40  ;;  %v114_v56 = vsel %vm68_vm0, %v67_v54, 0.0  ;;  %v111_v57 = vsel %vm68_vm0, %v66_v55, 0.0  ;;  %695 = vmatpush1.bf16.msra.mxu0 %v1706_v62  ;;  %v1711_v1 = vld [vmem:[%s3134_s7 + $0x10] ss:$8 sps:$4 sm:$0xff]   ;;  %v1996_v4 = vmov 0   ;;  %vm380_vm1 = vcmask 523264  }
  0x12   :  { %1639 = vmatmul.mubr.msk.bf16.gmra.mrb[4].mxu0 %vm68_vm0, %v168_v38  ;;  %1647 = vmatmul.mubr.msk.bf16.gmra.mrb[4].mxu1 %vm68_vm0, %v172_v39 }
  0x13   :  { %1653 = vmatpush3.bf16.msra.mxu1 %v1705_v59  ;;  %696 = vmatprep.subr.bf16.mxu0 %v1713_v0 }
  0x14   :  { %88 = vadd.xlane.f32.xlu0 %v87_v41  ;;  %1654 = vmatprep.subr.bf16.mxu1 %v1709_v61 }
  0x15   :  { %97 = vadd.xlane.f32.xlu1 %v96_v44  ;;  %697 = vmatpush1.bf16.msra.mxu0 %v1711_v1 }
  0x16   :  { %726 = vmatprep.mubr.bf16.mxu0 %v1996_v4 }
  0x17   :  { %1655 = vmatpush3.bf16.msra.mxu1 %v1709_v61 }
  0x18   :  { %94 = vadd.xlane.f32.xlu0 %v93_v45  ;;  %1656 = vmatprep.subr.bf16.mxu1 %v1710_v63 }
  0x19   :  { %103 = vadd.xlane.f32.xlu1 %v102_v48 }
  0x1b   :  { %1657 = vmatpush3.bf16.msra.mxu1 %v1710_v63 }
  0x1c   :  { %100 = vadd.xlane.f32.xlu0 %v99_v49 }
  0x1d   :  { %109 = vadd.xlane.f32.xlu1 %v108_v52 }
  0x20   :  { %106 = vadd.xlane.f32.xlu0 %v105_v53 }
  0x21   :  { %115 = vadd.xlane.f32.xlu1 %v114_v56 }
  0x24   :  { %112 = vadd.xlane.f32.xlu0 %v111_v57 }
  0x92   :  { %v77_v15 = vpop.xlane.xlu1 %76 }
  0x93   :  { %v71_v7 = vpop.xlane.xlu0 %70  ;;  %v119_v17 = vmax.f32 %v77_v15, 1e-24 }
  0x94   :  { %v117_v11 = vmax.f32 %v71_v7, 1e-24 }
  0x96   :  { %1716 = vrsqrt.f32 %v117_v11  ;;  %v80_v18 = vpop.xlane.xlu1 %79 }
  0x97   :  { %v120_v20 = vmax.f32 %v80_v18, 1e-24 }
  0x99   :  { %v74_v16 = vpop.xlane.xlu0 %73 }
  0x9a   :  { %v118_v19 = vmax.f32 %v74_v16, 1e-24  ;;  %v86_v23 = vpop.xlane.xlu1 %85 }
  0x9b   :  { %v122_v25 = vmax.f32 %v86_v23, 1e-24 }
  0x9c   :  { %1718 = vrsqrt.f32 %v118_v19 }
  0x9d   :  { %1720 = vrsqrt.f32 %v119_v17  ;;  %v83_v24 = vpop.xlane.xlu0 %82 }
  0x9e   :  { %1722 = vrsqrt.f32 %v120_v20  ;;  %v121_v29 = vmax.f32 %v83_v24, 1e-24  ;;  %v92_v34 = vpop.xlane.xlu1 %91 }
  0x9f   :  { %1724 = vrsqrt.f32 %v122_v25  ;;  %v124_v40 = vmax.f32 %v92_v34, 1e-24 }
  0xa0   :  { %v1717_v28 = vpop.eup %1716  ;;  %1726 = vrsqrt.f32 %v121_v29 }
  0xa1   :  { %v149_v30 = vmul.f32 %v1717_v28, %v2059_v2  ;;  %v89_v37 = vpop.xlane.xlu0 %88  ;;  %1728 = vrsqrt.f32 %v124_v40 }
  0xa2   :  { %v123_v41 = vmax.f32 %v89_v37, 1e-24  ;;  %v98_v2 = vpop.xlane.xlu1 %97 }
  0xa3   :  { %v126_v47 = vmax.f32 %v98_v2, 1e-24 }
  0xa4   :  { %1730 = vrsqrt.f32 %v123_v41 }
  0xa5   :  { %v95_v46 = vpop.xlane.xlu0 %94  ;;  %1732 = vrsqrt.f32 %v126_v47 }
  0xa6   :  { %v1719_v31 = vpop.eup %1718  ;;  %v125_v48 = vmax.f32 %v95_v46, 1e-24 }
  0xa7   :  { %v1721_v35 = vpop.eup %1720  ;;  %v150_v36 = vmul.f32 %v1719_v31, %v2064_v3 }
  0xa8   :  { %v1723_v38 = vpop.eup %1722  ;;  %v151_v42 = vmul.f32 %v1721_v35, %v2071_v5  ;;  %1734 = vrsqrt.f32 %v125_v48  ;;  %v104_v5 = vpop.xlane.xlu1 %103 }
  0xa9   :  { %v626_v39 = vpack.c.bf16 %v150_v36, %v149_v30  ;;  %v152_v43 = vmul.f32 %v1723_v38, %v2076_v6  ;;  %v1725_v44 = vpop.eup %1724  ;;  %v101_v52 = vpop.xlane.xlu0 %100  ;;  %v128_v54 = vmax.f32 %v104_v5, 1e-24 }
  0xaa   :  { %v1727_v3 = vpop.eup %1726  ;;  %v154_v50 = vmul.f32 %v1725_v44, %v2088_v9  ;;  %v127_v55 = vmax.f32 %v101_v52, 1e-24 }
  0xab   :  { %1580 = vmatmul.mubr.msk.bf16.vlgmr.msra.gmra.mrb[8].mxu0 %vm68_vm0, %v626_v39  ;;  %v627_v45 = vpack.c.bf16 %v152_v43, %v151_v42  ;;  %v153_v49 = vmul.f32 %v1727_v3, %v2083_v8  ;;  %v1729_v6 = vpop.eup %1728  ;;  %1736 = vrsqrt.f32 %v128_v54 }
  0xac   :  { %736 = vmatprep.mubr.bf16.mxu0 %v1996_v4  ;;  %v156_v57 = vmul.f32 %v1729_v6, %v2148_v27  ;;  %1738 = vrsqrt.f32 %v127_v55  ;;  %v110_v8 = vpop.xlane.xlu1 %109 }
  0xad   :  { %v628_v51 = vpack.c.bf16 %v154_v50, %v153_v49  ;;  %v107_v59 = vpop.xlane.xlu0 %106  ;;  %v130_v61 = vmax.f32 %v110_v8, 1e-24 }
  0xae   :  { %v1731_v53 = vpop.eup %1730  ;;  %v129_v62 = vmax.f32 %v107_v59, 1e-24 }
  0xaf   :  { %v155_v56 = vmul.f32 %v1731_v53, %v2143_v26  ;;  %v1733_v9 = vpop.eup %1732  ;;  %1740 = vrsqrt.f32 %v130_v61 }
  0xb0   :  { %v158_v0 = vmul.f32 %v1733_v9, %v2101_v12  ;;  %1742 = vrsqrt.f32 %v129_v62  ;;  %v116_v26 = vpop.xlane.xlu1 %115 }
  0xb1   :  { %v629_v58 = vpack.c.bf16 %v156_v57, %v155_v56  ;;  %v113_v7 = vpop.xlane.xlu0 %112  ;;  %v132_v15 = vmax.f32 %v116_v26, 1e-24 }
  0xb2   :  { %v1735_v60 = vpop.eup %1734  ;;  %v131_v16 = vmax.f32 %v113_v7, 1e-24 }
  0xb3   :  { %1581 = vmatmul.mubr.msk.bf16.gmra.mrb[12].mxu0 %vm68_vm0, %v627_v45  ;;  %v157_v63 = vmul.f32 %v1735_v60, %v2093_v10  ;;  %1744 = vrsqrt.f32 %v132_v15 }
  0xb4   :  { %746 = vmatprep.mubr.bf16.mxu0 %v1996_v4  ;;  %1746 = vrsqrt.f32 %v131_v16 }
  0xb5   :  { %v1737_v27 = vpop.eup %1736  ;;  %v630_v1 = vpack.c.bf16 %v158_v0, %v157_v63 }
  0xb6   :  { %v1739_v11 = vpop.eup %1738  ;;  %v160_v18 = vmul.f32 %v1737_v27, %v2111_v14  ;;  %v1552_v14 = vld [vmem:[%s3130_s3] ss:$0 sm:$0xff] }
  0xb7   :  { %v159_v17 = vmul.f32 %v1739_v11, %v2106_v13 }
  0xb9   :  { %v1741_v10 = vpop.eup %1740  ;;  %v631_v12 = vpack.c.bf16 %v160_v18, %v159_v17 }
  0xba   :  { %v1743_v19 = vpop.eup %1742  ;;  %v162_v23 = vmul.f32 %v1741_v10, %v2132_v22 }
  0xbb   :  { %1582 = vmatmul.mubr.msk.bf16.gmra.mrb[16].mxu0 %vm68_vm0, %v628_v51  ;;  %v161_v20 = vmul.f32 %v1743_v19, %v2127_v21 }
  0xbc   :  { %756 = vmatprep.mubr.bf16.mxu0 %v1996_v4 }
  0xbd   :  { %v1745_v24 = vpop.eup %1744  ;;  %v632_v25 = vpack.c.bf16 %v162_v23, %v161_v20 }
  0xbe   :  { %v1747_v13 = vpop.eup %1746  ;;  %v164_v29 = vmul.f32 %v1745_v24, %v2168_v33 }
  0xbf   :  { %v163_v28 = vmul.f32 %v1747_v13, %v2161_v32 }
  0xc1   :  { %v633_v40 = vpack.c.bf16 %v164_v29, %v163_v28 }
  0xc3   :  { %1583 = vmatmul.mubr.msk.bf16.gmra.mrb[20].mxu0 %vm68_vm0, %v629_v58 }
  0xc4   :  { %766 = vmatprep.mubr.bf16.mxu0 %v1996_v4 }
  0xcb   :  { %1584 = vmatmul.mubr.msk.bf16.gmra.mrb[24].mxu0 %vm68_vm0, %v630_v1 }
  0xcc   :  { %776 = vmatprep.mubr.bf16.mxu0 %v1996_v4 }
  0xd3   :  { %1585 = vmatmul.mubr.msk.bf16.gmra.mrb[28].mxu0 %vm68_vm0, %v631_v12 }
  0xd4   :  { %786 = vmatprep.mubr.bf16.mxu0 %v1996_v4 }
  0xdb   :  { %1586 = vmatmul.mubr.msk.bf16.gmra.mrb[32].mxu0 %vm68_vm0, %v632_v25 }
  0xdc   :  { %796 = vmatprep.mubr.bf16.mxu0 %v1996_v4 }
  0xdd   :  { %v1636_v21 = vpop.f32.mrb[0].mxu0  ;;  %v1644_v30 = vpop.f32.mrb[0].mxu1 }
  0xde   :  { %v263_v22 = vadd.f32 %v1636_v21, %v1552_v14  ;;  %v254_v31 = vpop.f32.mrb[1].mxu0  ;;  %v295_v34 = vadd.f32 %v1644_v30, %v1552_v14  ;;  %v286_v35 = vpop.f32.mrb[1].mxu1 }
  0xdf   :  { %v255_v36 = vadd.f32 %v1552_v14, %v254_v31  ;;  %v1637_v37 = vpop.f32.mrb[2].mxu0  ;;  %v287_v38 = vadd.f32 %v1552_v14, %v286_v35  ;;  %v1645_v39 = vpop.f32.mrb[2].mxu1 }
  0xe0   :  { %v266_v41 = vadd.f32 %v1637_v37, %v1552_v14  ;;  %v257_v42 = vpop.f32.mrb[3].mxu0  ;;  %v327_v43 = vmax.f32 %v295_v34, 0.0  ;;  %v298_v2 = vadd.f32 %v1645_v39, %v1552_v14  ;;  %v289_v32 = vpop.f32.mrb[3].mxu1  ;;  %v319_v4 = vmax.f32 %v263_v22, 0.0 }
  0xe1   :  { %v258_v44 = vadd.f32 %v1552_v14, %v257_v42  ;;  %v325_v33 = vmax.f32 %v287_v38, 0.0  ;;  %v290_v45 = vadd.f32 %v1552_v14, %v289_v32  ;;  %v317_v47 = vmax.f32 %v255_v36, 0.0 }
  0xe2   :  { %v320_v46 = vmax.f32 %v266_v41, 0.0  ;;  %v328_v3 = vmax.f32 %v298_v2, 0.0 }
  0xe3   :  { %v318_v48 = vmax.f32 %v258_v44, 0.0  ;;  %v326_v49 = vmax.f32 %v290_v45, 0.0  ;;  %1587 = vmatmul.mubr.msk.bf16.gmra.mrb[36].mxu0 %vm68_vm0, %v633_v40 }
  0xe4   :  { %v334_v50 = vpack.c.bf16 %v320_v46, %v319_v4  ;;  %v338_v5 = vpack.c.bf16 %v328_v3, %v327_v43 }
  0xe5   :  { %v333_v6 = vpack.c.bf16 %v318_v48, %v317_v47  ;;  %v1640_v51 = vpop.f32.mrb[4].mxu0  ;;  %v337_v52 = vpack.c.bf16 %v326_v49, %v325_v33  ;;  %v1648_v53 = vpop.f32.mrb[4].mxu1 }
  0xe6   :  { %v279_v54 = vadd.f32 %v1640_v51, %v1552_v14  ;;  %v270_v55 = vpop.f32.mrb[5].mxu0  ;;  %v311_v56 = vadd.f32 %v1648_v53, %v1552_v14  ;;  %v302_v57 = vpop.f32.mrb[5].mxu1 }
  0xe7   :  { %v271_v8 = vadd.f32 %v1552_v14, %v270_v55  ;;  %v1641_v9 = vpop.f32.mrb[6].mxu0  ;;  %1658 = vmatprep.mubr.msk.bf16.mxu1 %vm380_vm1, %v333_v6  ;;  %v303_v58 = vadd.f32 %v1552_v14, %v302_v57  ;;  %v1649_v59 = vpop.f32.mrb[6].mxu1 }
  0xe8   :  { %v282_v60 = vadd.f32 %v1641_v9, %v1552_v14  ;;  %v273_v61 = vpop.f32.mrb[7].mxu0  ;;  %1659 = vmatmul.mubr.msk.bf16.vlgmr.msra.gmra.mrb[8].mxu1 %vm380_vm1, %v334_v50  ;;  %v331_v62 = vmax.f32 %v311_v56, 0.0  ;;  %v314_v63 = vadd.f32 %v1649_v59, %v1552_v14  ;;  %v305_v0 = vpop.f32.mrb[7].mxu1  ;;  %v323_v7 = vmax.f32 %v279_v54, 0.0  ;;  %v2342_v50 = vld [vmem:[%s3132_s5] ss:$0 sm:$0xff] }
  0xe9   :  { %v274_v26 = vadd.f32 %v1552_v14, %v273_v61  ;;  %v329_v27 = vmax.f32 %v303_v58, 0.0  ;;  %v306_v1 = vadd.f32 %v1552_v14, %v305_v0  ;;  %v321_v16 = vmax.f32 %v271_v8, 0.0 }
  0xea   :  { %v324_v11 = vmax.f32 %v282_v60, 0.0  ;;  %v332_v15 = vmax.f32 %v314_v63, 0.0 }
  0xeb   :  { %v322_v17 = vmax.f32 %v274_v26, 0.0  ;;  %v330_v18 = vmax.f32 %v306_v1, 0.0 }
  0xec   :  { %v336_v10 = vpack.c.bf16 %v324_v11, %v323_v7  ;;  %v340_v12 = vpack.c.bf16 %v332_v15, %v331_v62 }
  0xed   :  { %v335_v19 = vpack.c.bf16 %v322_v17, %v321_v16  ;;  %v339_v20 = vpack.c.bf16 %v330_v18, %v329_v27 }
  0xef   :  { %1662 = vmatprep.mubr.msk.bf16.mxu1 %vm380_vm1, %v335_v19 }
  0xf0   :  { %1663 = vmatmul.mubr.msk.bf16.gmra.mrb[12].mxu1 %vm380_vm1, %v336_v10 }
  0xf1   :  { %1666 = vmatprep.mubr.msk.bf16.mxu1 %vm380_vm1, %v337_v52 }
  0xf8   :  { %1667 = vmatmul.mubr.msk.bf16.gmra.mrb[16].mxu1 %vm380_vm1, %v338_v5 }
  0xf9   :  { %1670 = vmatprep.mubr.msk.bf16.mxu1 %vm380_vm1, %v339_v20 }
 0x100   :  { %1671 = vmatmul.mubr.msk.bf16.gmra.mrb[20].mxu1 %vm380_vm1, %v340_v12 }
 0x17e   :  { %v2275_v23 = vpop.f32.mrb[8].mxu0 }
 0x17f   :  { %v2277_v24 = vpop.f32.mrb[9].mxu0 }
 0x180   :  { %v2279_v25 = vpop.f32.mrb[10].mxu0 }
 0x181   :  { %v2281_v13 = vpop.f32.mrb[11].mxu0 }
 0x186   :  { %v2283_v14 = vpop.f32.mrb[12].mxu0 }
 0x187   :  { %v2285_v28 = vpop.f32.mrb[13].mxu0 }
 0x188   :  { %v2287_v29 = vpop.f32.mrb[14].mxu0 }
 0x189   :  { %v2289_v21 = vpop.f32.mrb[15].mxu0 }
 0x18e   :  { %v2291_v30 = vpop.f32.mrb[16].mxu0 }
 0x18f   :  { %v2293_v22 = vpop.f32.mrb[17].mxu0 }
 0x190   :  { %v2295_v31 = vpop.f32.mrb[18].mxu0 }
 0x191   :  { %v2297_v34 = vpop.f32.mrb[19].mxu0 }
 0x196   :  { %v2299_v35 = vpop.f32.mrb[20].mxu0 }
 0x197   :  { %v2301_v36 = vpop.f32.mrb[21].mxu0 }
 0x198   :  { %v2303_v37 = vpop.f32.mrb[22].mxu0 }
 0x199   :  { %v2305_v38 = vpop.f32.mrb[23].mxu0 }
 0x19e   :  { %v2307_v39 = vpop.f32.mrb[24].mxu0 }
 0x19f   :  { %v2309_v40 = vpop.f32.mrb[25].mxu0 }
 0x1a0   :  { %v2311_v41 = vpop.f32.mrb[26].mxu0 }
 0x1a1   :  { %v2313_v42 = vpop.f32.mrb[27].mxu0 }
 0x1a6   :  { %v2315_v43 = vpop.f32.mrb[28].mxu0 }
 0x1a7   :  { %v2317_v2 = vpop.f32.mrb[29].mxu0 }
 0x1a8   :  { %v2319_v32 = vpop.f32.mrb[30].mxu0 }
 0x1a9   :  { %v2321_v44 = vpop.f32.mrb[31].mxu0 }
 0x1ae   :  { %v2323_v33 = vpop.f32.mrb[32].mxu0 }
 0x1af   :  { %v2325_v45 = vpop.f32.mrb[33].mxu0 }
 0x1b0   :  { %v2327_v4 = vpop.f32.mrb[34].mxu0 }
 0x1b1   :  { %v2329_v46 = vpop.f32.mrb[35].mxu0 }
 0x1b6   :  { %v2331_v3 = vpop.f32.mrb[36].mxu0 }
 0x1b7   :  { %v2333_v47 = vpop.f32.mrb[37].mxu0 }
 0x1b8   :  { %v2335_v48 = vpop.f32.mrb[38].mxu0 }
 0x1b9   :  { %v2337_v49 = vpop.f32.mrb[39].mxu0 }
 0x1bb   :  { %v1660_v5 = vpop.f32.mrb[8].mxu1 }
 0x1bc   :  { %v439_v6 = vpop.f32.mrb[9].mxu1  ;;  %v2345_v51 = vadd.f32 %v1660_v5, %v2342_v50 }
 0x1bd   :  { %v2348_v52 = vadd.f32 %v2342_v50, %v439_v6  ;;  %v1661_v53 = vpop.f32.mrb[10].mxu1  ;;  %v640_v6 = vlaneseq }
 0x1be   :  { %v442_v54 = vpop.f32.mrb[11].mxu1  ;;  %v2351_v55 = vadd.f32 %v1661_v53, %v2342_v50  ;;  %v504_v58 = vmul.f32 %v2345_v51, %v2345_v51 }
 0x1bf   :  { %v2354_v56 = vadd.f32 %v2342_v50, %v442_v54  ;;  %v502_v57 = vmul.f32 %v2348_v52, %v2348_v52 }
 0x1c0   :  { %v505_v61 = vmul.f32 %v2351_v55, %v2351_v55  ;;  %v524_v27 = vsel %vm68_vm0, %v504_v58, 0.0 }
 0x1c1   :  { %v518_v8 = vsel %vm68_vm0, %v502_v57, 0.0  ;;  %v503_v9 = vmul.f32 %v2354_v56, %v2354_v56 }
 0x1c2   :  { %519 = vadd.xlane.f32.xlu0 %v518_v8  ;;  %v527_v15 = vsel %vm68_vm0, %v505_v61, 0.0 }
 0x1c3   :  { %v1664_v59 = vpop.f32.mrb[12].mxu1  ;;  %v521_v60 = vsel %vm68_vm0, %v503_v9, 0.0 }
 0x1c4   :  { %v455_v62 = vpop.f32.mrb[13].mxu1  ;;  %522 = vadd.xlane.f32.xlu1 %v521_v60  ;;  %v2367_v63 = vadd.f32 %v1664_v59, %v2342_v50 }
 0x1c5   :  { %v2370_v0 = vadd.f32 %v2342_v50, %v455_v62  ;;  %v1665_v26 = vpop.f32.mrb[14].mxu1  ;;  %v2406_v62 = vshrl.u32 %v640_v6, 7 }
 0x1c6   :  { %v458_v1 = vpop.f32.mrb[15].mxu1  ;;  %525 = vadd.xlane.f32.xlu0 %v524_v27  ;;  %v2374_v7 = vadd.f32 %v1665_v26, %v2342_v50  ;;  %v508_v10 = vmul.f32 %v2367_v63, %v2367_v63 }
 0x1c7   :  { %v2377_v11 = vadd.f32 %v2342_v50, %v458_v1  ;;  %v506_v16 = vmul.f32 %v2370_v0, %v2370_v0 }
 0x1c8   :  { %528 = vadd.xlane.f32.xlu1 %v527_v15  ;;  %v509_v20 = vmul.f32 %v2374_v7, %v2374_v7  ;;  %v536_v8 = vsel %vm68_vm0, %v508_v10, 0.0  ;;  %v642_v10 = vsub.s32 0, %v2406_v62 }
 0x1c9   :  { %v530_v17 = vsel %vm68_vm0, %v506_v16, 0.0  ;;  %v507_v18 = vmul.f32 %v2377_v11, %v2377_v11 }
 0x1ca   :  { %531 = vadd.xlane.f32.xlu0 %v530_v17  ;;  %v539_v60 = vsel %vm68_vm0, %v509_v20, 0.0 }
 0x1cb   :  { %v1668_v12 = vpop.f32.mrb[16].mxu1  ;;  %v533_v19 = vsel %vm68_vm0, %v507_v18, 0.0 }
 0x1cc   :  { %v471_v5 = vpop.f32.mrb[17].mxu1  ;;  %534 = vadd.xlane.f32.xlu1 %v533_v19  ;;  %v2391_v53 = vadd.f32 %v1668_v12, %v2342_v50 }
 0x1cd   :  { %v2394_v54 = vadd.f32 %v2342_v50, %v471_v5  ;;  %v1669_v57 = vpop.f32.mrb[18].mxu1 }
 0x1ce   :  { %v474_v9 = vpop.f32.mrb[19].mxu1  ;;  %537 = vadd.xlane.f32.xlu0 %v536_v8  ;;  %v2398_v58 = vadd.f32 %v1669_v57, %v2342_v50  ;;  %v512_v1 = vmul.f32 %v2391_v53, %v2391_v53  ;;  %v2427_v57 = vld [vmem:[%s3135_s8] sm:$0x3] }
 0x1cf   :  { %v2401_v59 = vadd.f32 %v2342_v50, %v474_v9  ;;  %v510_v61 = vmul.f32 %v2394_v54, %v2394_v54 }
 0x1d0   :  { %540 = vadd.xlane.f32.xlu1 %v539_v60  ;;  %v513_v17 = vmul.f32 %v2398_v58, %v2398_v58  ;;  %v548_v5 = vsel %vm68_vm0, %v512_v1, 0.0 }
 0x1d1   :  { %v542_v26 = vsel %vm68_vm0, %v510_v61, 0.0  ;;  %v511_v27 = vmul.f32 %v2401_v59, %v2401_v59 }
 0x1d2   :  { %543 = vadd.xlane.f32.xlu0 %v542_v26  ;;  %v551_v61 = vsel %vm68_vm0, %v513_v17, 0.0 }
 0x1d3   :  { %v1672_v15 = vpop.f32.mrb[20].mxu1  ;;  %v545_v16 = vsel %vm68_vm0, %v511_v27, 0.0  ;;  %v2439_v27 = vrot.slane %v2427_v57, %v642_v10 }
 0x1d4   :  { %v487_v18 = vpop.f32.mrb[21].mxu1  ;;  %546 = vadd.xlane.f32.xlu1 %v545_v16  ;;  %v2418_v12 = vadd.f32 %v1672_v15, %v2342_v50 }
 0x1d5   :  { %v2421_v19 = vadd.f32 %v2342_v50, %v487_v18  ;;  %v1673_v20 = vpop.f32.mrb[22].mxu1  ;;  %v2446_v18 = vand.u32 127, %v640_v6  ;;  %v729_v10 = vadd.f32 %v2275_v23, %v2439_v27  ;;  %v733_v6 = vadd.f32 %v2279_v25, %v2439_v27 }
 0x1d6   :  { %v490_v8 = vpop.f32.mrb[23].mxu1  ;;  %549 = vadd.xlane.f32.xlu0 %v548_v5  ;;  %v2430_v9 = vadd.f32 %v1673_v20, %v2342_v50  ;;  %v516_v16 = vmul.f32 %v2418_v12, %v2418_v12  ;;  %v1714_v5 = vld [vmem:[%s3133_s6] sm:$0xff]   ;;  %v739_v23 = vadd.f32 %v2283_v14, %v2439_v27  ;;  %v743_v25 = vadd.f32 %v2287_v29, %v2439_v27 }
 0x1d7   :  { %v2433_v60 = vadd.f32 %v2342_v50, %v490_v8  ;;  %v514_v26 = vmul.f32 %v2421_v19, %v2421_v19  ;;  %3162 = vst [vmem:[#allocation6_spill] sm:$0xff] %v2446_v18  ;;  %vm809_vm2 = vcmp.lt.s32.totalorder %v2446_v18, 16  ;;  %1674 = vmatprep.subr.bf16.mxu1 %v1714_v5  ;;  %v749_v14 = vadd.f32 %v2291_v30, %v2439_v27 }
 0x1d8   :  { %552 = vadd.xlane.f32.xlu1 %v551_v61  ;;  %v517_v17 = vmul.f32 %v2430_v9, %v2430_v9  ;;  %v560_v20 = vsel %vm68_vm0, %v516_v16, 0.0  ;;  %1675 = vmatpush3.bf16.msra.mxu1 %v1714_v5  ;;  %v2465_v61 = vsel %vm809_vm2, %v729_v10, -1e+30  ;;  %v753_v29 = vadd.f32 %v2295_v31, %v2439_v27 }
 0x1d9   :  { %v554_v1 = vsel %vm68_vm0, %v514_v26, 0.0  ;;  %v515_v15 = vmul.f32 %v2433_v60, %v2433_v60  ;;  %v1715_v26 = vld [vmem:[%s3133_s6 + $0x8] sm:$0xff]   ;;  %v2489_v16 = vsel %vm809_vm2, %v743_v25, -1e+30  ;;  %v2496_v30 = vsel %vm809_vm2, %v749_v14, -1e+30 }
 0x1da   :  { %555 = vadd.xlane.f32.xlu0 %v554_v1  ;;  %v563_v8 = vsel %vm68_vm0, %v517_v17, 0.0  ;;  %v2475_v1 = vsel %vm809_vm2, %v733_v6, -1e+30  ;;  %1676 = vmatprep.subr.bf16.mxu1 %v1715_v26  ;;  %3163 = vst [vmem:[#allocation7_spill] sm:$0xff] %v2489_v16  ;;  %3164 = vst [vmem:[#allocation8_spill] sm:$0xff] %v2496_v30  ;;  %v763_v17 = vadd.f32 %v2303_v37, %v2439_v27 }
 0x1db   :  { %v557_v50 = vsel %vm68_vm0, %v515_v15, 0.0  ;;  %v2482_v15 = vsel %vm809_vm2, %v739_v23, -1e+30  ;;  %v2503_v31 = vsel %vm809_vm2, %v753_v29, -1e+30  ;;  %v769_v10 = vadd.f32 %v2307_v39, %v2439_v27 }
 0x1dc   :  { %558 = vadd.xlane.f32.xlu1 %v557_v50  ;;  %1677 = vmatpush3.bf16.msra.mxu1 %v1715_v26  ;;  %v759_v50 = vadd.f32 %v2299_v35, %v2439_v27  ;;  %3165 = vst [vmem:[#allocation9_spill] sm:$0xff] %v2503_v31  ;;  %v2517_v37 = vsel %vm809_vm2, %v763_v17, -1e+30  ;;  %v779_v5 = vadd.f32 %v2315_v43, %v2439_v27 }
 0x1dd   :  { %3167 = vst [vmem:[#allocation11_spill] sm:$0xff] %v2517_v37  ;;  %v2524_v39 = vsel %vm809_vm2, %v769_v10, -1e+30  ;;  %v783_v6 = vadd.f32 %v2319_v32, %v2439_v27  ;;  %v789_v43 = vadd.f32 %v2323_v33, %v2439_v27  ;;  %v793_v32 = vadd.f32 %v2327_v4, %v2439_v27 }
 0x1de   :  { %561 = vadd.xlane.f32.xlu0 %v560_v20  ;;  %v2510_v35 = vsel %vm809_vm2, %v759_v50, -1e+30  ;;  %v773_v20 = vadd.f32 %v2311_v41, %v2439_v27  ;;  %3168 = vst [vmem:[#allocation12_spill] sm:$0xff] %v2524_v39  ;;  %v2539_v23 = vsel %vm809_vm2, %v779_v5, -1e+30  ;;  %v799_v26 = vadd.f32 %v2331_v3, %v2439_v27 }
 0x1df   :  { %3166 = vst [vmem:[#allocation10_spill] sm:$0xff] %v2510_v35  ;;  %3170 = vst [vmem:[#allocation14_spill] sm:$0xff] %v2539_v23  ;;  %v2548_v25 = vsel %vm809_vm2, %v783_v6, -1e+30  ;;  %v803_v4 = vadd.f32 %v2335_v48, %v2439_v27  ;;  %v2561_v3 = vsel %vm809_vm2, %v793_v32, -1e+30 }
 0x1e0   :  { %564 = vadd.xlane.f32.xlu1 %v563_v8  ;;  %v2531_v41 = vsel %vm809_vm2, %v773_v20, -1e+30  ;;  %v646_v8 = vsub.s32 1, %v2406_v62  ;;  %3171 = vst [vmem:[#allocation15_spill] sm:$0xff] %v2548_v25  ;;  %v2554_v62 = vsel %vm809_vm2, %v789_v43, -1e+30 }
 0x1e1   :  { %3169 = vst [vmem:[#allocation13_spill] sm:$0xff] %v2531_v41  ;;  %3172 = vst [vmem:[#allocation16_spill] sm:$0xff] %v2554_v62  ;;  %v2565_v14 = vsel %vm809_vm2, %v799_v26, -1e+30  ;;  %v2573_v50 = vsel %vm809_vm2, %v803_v4, -1e+30 }
 0x1e2   :  { %842 = vmax.xlane.f32.xlu0 %v2465_v61  ;;  %v647_v33 = vrot.slane %v2427_v57, %v646_v8  ;;  %3173 = vst [vmem:[#allocation17_spill] sm:$0xff] %v2561_v3  ;;  %3174 = vst [vmem:[#allocation18_spill] sm:$0xff] %v2565_v14 }
 0x1e3   :  { %3175 = vst [vmem:[#allocation19_spill] sm:$0xff] %v2573_v50 }
 0x1e4   :  { %844 = vmax.xlane.f32.xlu1 %v2475_v1  ;;  %v731_v57 = vadd.f32 %v2277_v24, %v647_v33  ;;  %v735_v29 = vadd.f32 %v2281_v13, %v647_v33  ;;  %v741_v48 = vadd.f32 %v2285_v28, %v647_v33  ;;  %v745_v24 = vadd.f32 %v2289_v21, %v647_v33 }
 0x1e5   :  { %v751_v13 = vadd.f32 %v2293_v22, %v647_v33  ;;  %v755_v28 = vadd.f32 %v2297_v34, %v647_v33  ;;  %v761_v21 = vadd.f32 %v2301_v36, %v647_v33  ;;  %v765_v22 = vadd.f32 %v2305_v38, %v647_v33 }
 0x1e6   :  { %846 = vmax.xlane.f32.xlu0 %v2482_v15  ;;  %v2579_v27 = vsel %vm809_vm2, %v731_v57, -1e+30  ;;  %v2585_v17 = vsel %vm809_vm2, %v735_v29, -1e+30  ;;  %v2591_v10 = vsel %vm809_vm2, %v741_v48, -1e+30  ;;  %v771_v34 = vadd.f32 %v2309_v40, %v647_v33 }
 0x1e7   :  { %v2597_v20 = vsel %vm809_vm2, %v745_v24, -1e+30  ;;  %v2603_v5 = vsel %vm809_vm2, %v751_v13, -1e+30  ;;  %v2609_v6 = vsel %vm809_vm2, %v755_v28, -1e+30  ;;  %v775_v36 = vadd.f32 %v2313_v42, %v647_v33 }
 0x1e8   :  { %848 = vmax.xlane.f32.xlu1 %v2489_v16  ;;  %3176 = vst [vmem:[#allocation20_spill] sm:$0xff] %v2609_v6  ;;  %v2615_v8 = vsel %vm809_vm2, %v761_v21, -1e+30  ;;  %v2621_v43 = vsel %vm809_vm2, %v765_v22, -1e+30  ;;  %v781_v38 = vadd.f32 %v2317_v2, %v647_v33  ;;  %v785_v40 = vadd.f32 %v2321_v44, %v647_v33 }
 0x1e9   :  { %v2627_v32 = vsel %vm809_vm2, %v771_v34, -1e+30  ;;  %v2633_v26 = vsel %vm809_vm2, %v775_v36, -1e+30  ;;  %v791_v42 = vadd.f32 %v2325_v45, %v647_v33  ;;  %v795_v2 = vadd.f32 %v2329_v46, %v647_v33 }
 0x1ea   :  { %850 = vmax.xlane.f32.xlu0 %v2496_v30  ;;  %v2639_v4 = vsel %vm809_vm2, %v781_v38, -1e+30  ;;  %v2645_v57 = vsel %vm809_vm2, %v785_v40, -1e+30  ;;  %v801_v44 = vadd.f32 %v2333_v47, %v647_v33  ;;  %v805_v45 = vadd.f32 %v2337_v49, %v647_v33 }
 0x1eb   :  { %v2651_v29 = vsel %vm809_vm2, %v791_v42, -1e+30  ;;  %v2657_v48 = vsel %vm809_vm2, %v795_v2, -1e+30 }
 0x1ec   :  { %852 = vmax.xlane.f32.xlu1 %v2503_v31  ;;  %3177 = vst [vmem:[#allocation21_spill] sm:$0xff] %v2651_v29  ;;  %3178 = vst [vmem:[#allocation22_spill] sm:$0xff] %v2657_v48  ;;  %v2662_v46 = vsel %vm809_vm2, %v801_v44, -1e+30  ;;  %v2667_v47 = vsel %vm809_vm2, %v805_v45, -1e+30 }
 0x1ed   :  { %3179 = vst [vmem:[#allocation23_spill] sm:$0xff] %v2662_v46  ;;  %3180 = vst [vmem:[#allocation24_spill] sm:$0xff] %v2667_v47 }
 0x1ee   :  { %854 = vmax.xlane.f32.xlu0 %v2510_v35 }
 0x1f0   :  { %856 = vmax.xlane.f32.xlu1 %v2517_v37 }
 0x1f2   :  { %858 = vmax.xlane.f32.xlu0 %v2524_v39 }
 0x1f4   :  { %860 = vmax.xlane.f32.xlu1 %v2531_v41 }
 0x1f6   :  { %862 = vmax.xlane.f32.xlu0 %v2539_v23 }
 0x1f8   :  { %864 = vmax.xlane.f32.xlu1 %v2548_v25 }
 0x1fa   :  { %866 = vmax.xlane.f32.xlu0 %v2554_v62 }
 0x1fc   :  { %868 = vmax.xlane.f32.xlu1 %v2561_v3 }
 0x1fe   :  { %870 = vmax.xlane.f32.xlu0 %v2565_v14 }
 0x200   :  { %872 = vmax.xlane.f32.xlu1 %v2573_v50 }
 0x202   :  { %1018 = vmax.xlane.f32.xlu0 %v2579_v27 }
 0x204   :  { %1020 = vmax.xlane.f32.xlu1 %v2585_v17 }
 0x206   :  { %1022 = vmax.xlane.f32.xlu0 %v2591_v10 }
 0x208   :  { %1024 = vmax.xlane.f32.xlu1 %v2597_v20 }
 0x20a   :  { %1026 = vmax.xlane.f32.xlu0 %v2603_v5 }
 0x20c   :  { %1028 = vmax.xlane.f32.xlu1 %v2609_v6 }
 0x20e   :  { %1030 = vmax.xlane.f32.xlu0 %v2615_v8 }
 0x210   :  { %1032 = vmax.xlane.f32.xlu1 %v2621_v43 }
 0x212   :  { %1034 = vmax.xlane.f32.xlu0 %v2627_v32 }
 0x214   :  { %1036 = vmax.xlane.f32.xlu1 %v2633_v26 }
 0x216   :  { %1038 = vmax.xlane.f32.xlu0 %v2639_v4 }
 0x218   :  { %1040 = vmax.xlane.f32.xlu1 %v2645_v57 }
 0x21a   :  { %1042 = vmax.xlane.f32.xlu0 %v2651_v29 }
 0x21c   :  { %1044 = vmax.xlane.f32.xlu1 %v2657_v48 }
 0x21e   :  { %1046 = vmax.xlane.f32.xlu0 %v2662_v46 }
 0x220   :  { %1048 = vmax.xlane.f32.xlu1 %v2667_v47 }
 0x24f   :  { %v520_v24 = vpop.xlane.xlu0 %519 }
 0x250   :  { %v566_v49 = vmax.f32 %v520_v24, 1e-24 }
 0x251   :  { %v523_v33 = vpop.xlane.xlu1 %522 }
 0x252   :  { %1748 = vrsqrt.f32 %v566_v49  ;;  %v567_v13 = vmax.f32 %v523_v33, 1e-24 }
 0x253   :  { %v526_v28 = vpop.xlane.xlu0 %525 }
 0x254   :  { %1750 = vrsqrt.f32 %v567_v13  ;;  %v568_v21 = vmax.f32 %v526_v28, 1e-24 }
 0x255   :  { %v529_v22 = vpop.xlane.xlu1 %528 }
 0x256   :  { %1752 = vrsqrt.f32 %v568_v21  ;;  %v569_v34 = vmax.f32 %v529_v22, 1e-24 }
 0x257   :  { %v532_v36 = vpop.xlane.xlu0 %531 }
 0x258   :  { %1754 = vrsqrt.f32 %v569_v34  ;;  %v570_v38 = vmax.f32 %v532_v36, 1e-24 }
 0x259   :  { %v535_v40 = vpop.xlane.xlu1 %534 }
 0x25a   :  { %1756 = vrsqrt.f32 %v570_v38  ;;  %v571_v42 = vmax.f32 %v535_v40, 1e-24 }
 0x25b   :  { %v538_v2 = vpop.xlane.xlu0 %537 }
 0x25c   :  { %v1749_v44 = vpop.eup %1748  ;;  %1758 = vrsqrt.f32 %v571_v42  ;;  %v572_v45 = vmax.f32 %v538_v2, 1e-24 }
 0x25d   :  { %v541_v24 = vpop.xlane.xlu1 %540  ;;  %v598_v13 = vmul.f32 %v1749_v44, %v2348_v52 }
 0x25e   :  { %v1751_v18 = vpop.eup %1750  ;;  %1760 = vrsqrt.f32 %v572_v45  ;;  %v573_v49 = vmax.f32 %v541_v24, 1e-24 }
 0x25f   :  { %v544_v33 = vpop.xlane.xlu0 %543  ;;  %v599_v28 = vmul.f32 %v1751_v18, %v2354_v56 }
 0x260   :  { %v1753_v21 = vpop.eup %1752  ;;  %1762 = vrsqrt.f32 %v573_v49  ;;  %v574_v22 = vmax.f32 %v544_v33, 1e-24 }
 0x261   :  { %v547_v34 = vpop.xlane.xlu1 %546  ;;  %v614_v36 = vpack.c.bf16 %v599_v28, %v598_v13  ;;  %v600_v42 = vmul.f32 %v1753_v21, %v2345_v51 }
 0x262   :  { %v1755_v38 = vpop.eup %1754  ;;  %1764 = vrsqrt.f32 %v574_v22  ;;  %v575_v40 = vmax.f32 %v547_v34, 1e-24 }
 0x263   :  { %v601_v2 = vmul.f32 %v1755_v38, %v2351_v55  ;;  %1678 = vmatprep.mubr.msk.bf16.mxu1 %vm68_vm0, %v614_v36  ;;  %v550_v45 = vpop.xlane.xlu0 %549 }
 0x264   :  { %v1757_v24 = vpop.eup %1756  ;;  %1766 = vrsqrt.f32 %v575_v40  ;;  %v576_v52 = vmax.f32 %v550_v45, 1e-24 }
 0x265   :  { %v615_v44 = vpack.c.bf16 %v601_v2, %v600_v42  ;;  %v553_v56 = vpop.xlane.xlu1 %552  ;;  %v602_v13 = vmul.f32 %v1757_v24, %v2370_v0 }
 0x266   :  { %v1759_v18 = vpop.eup %1758  ;;  %1768 = vrsqrt.f32 %v576_v52  ;;  %v577_v49 = vmax.f32 %v553_v56, 1e-24 }
 0x267   :  { %1679 = vmatmul.mubr.msk.bf16.vlgmr.msra.gmra.mrb[24].mxu1 %vm68_vm0, %v615_v44  ;;  %v556_v33 = vpop.xlane.xlu0 %555  ;;  %v603_v51 = vmul.f32 %v1759_v18, %v2377_v11 }
 0x268   :  { %v1761_v28 = vpop.eup %1760  ;;  %1770 = vrsqrt.f32 %v577_v49  ;;  %v578_v55 = vmax.f32 %v556_v33, 1e-24 }
 0x269   :  { %v559_v21 = vpop.xlane.xlu1 %558  ;;  %v616_v22 = vpack.c.bf16 %v603_v51, %v602_v13  ;;  %v604_v40 = vmul.f32 %v1761_v28, %v2367_v63 }
 0x26a   :  { %v1763_v34 = vpop.eup %1762  ;;  %1772 = vrsqrt.f32 %v578_v55  ;;  %v579_v36 = vmax.f32 %v559_v21, 1e-24 }
 0x26b   :  { %1682 = vmatprep.mubr.msk.bf16.mxu1 %vm68_vm0, %v616_v22  ;;  %v562_v38 = vpop.xlane.xlu0 %561  ;;  %v605_v42 = vmul.f32 %v1763_v34, %v2374_v7 }
 0x26c   :  { %v1765_v2 = vpop.eup %1764  ;;  %1774 = vrsqrt.f32 %v579_v36  ;;  %v580_v0 = vmax.f32 %v562_v38, 1e-24 }
 0x26d   :  { %v565_v45 = vpop.xlane.xlu1 %564  ;;  %v617_v11 = vpack.c.bf16 %v605_v42, %v604_v40  ;;  %v606_v56 = vmul.f32 %v1765_v2, %v2394_v54 }
 0x26e   :  { %v1767_v24 = vpop.eup %1766  ;;  %1776 = vrsqrt.f32 %v580_v0  ;;  %v581_v52 = vmax.f32 %v565_v45, 1e-24 }
 0x26f   :  { %1683 = vmatmul.mubr.msk.bf16.gmra.mrb[28].mxu1 %vm68_vm0, %v617_v11  ;;  %v2682_v44 = vpop.xlane.xlu0 %842  ;;  %v607_v18 = vmul.f32 %v1767_v24, %v2401_v59 }
 0x270   :  { %v1769_v49 = vpop.eup %1768  ;;  %1778 = vrsqrt.f32 %v581_v52  ;;  %v874_v63 = vsub.f32 %v2465_v61, %v2682_v44 }
 0x271   :  { %v2688_v7 = vpop.xlane.xlu1 %844  ;;  %v618_v33 = vpack.c.bf16 %v607_v18, %v606_v56  ;;  %v608_v54 = vmul.f32 %v1769_v49, %v2391_v53 }
 0x272   :  { %v1771_v13 = vpop.eup %1770  ;;  %v890_v51 = vmul.f32 1.442695, %v874_v63  ;;  %v875_v28 = vsub.f32 %v2475_v1, %v2688_v7 }
 0x273   :  { %1686 = vmatprep.mubr.msk.bf16.mxu1 %vm68_vm0, %v618_v33  ;;  %v2693_v55 = vpop.xlane.xlu0 %846  ;;  %v609_v59 = vmul.f32 %v1771_v13, %v2398_v58 }
 0x274   :  { %v1773_v21 = vpop.eup %1772  ;;  %1780 = vpow2.f32 %v890_v51  ;;  %v892_v22 = vmul.f32 1.442695, %v875_v28 }
 0x275   :  { %v2697_v34 = vpop.xlane.xlu1 %848  ;;  %v619_v36 = vpack.c.bf16 %v609_v59, %v608_v54  ;;  %v610_v42 = vmul.f32 %v1773_v21, %v2421_v19  ;;  %v876_v59 = vsub.f32 %v2482_v15, %v2693_v55 }
 0x276   :  { %v1775_v38 = vpop.eup %1774  ;;  %1782 = vpow2.f32 %v892_v22 }
 0x277   :  { %1687 = vmatmul.mubr.msk.bf16.gmra.mrb[32].mxu1 %vm68_vm0, %v619_v36  ;;  %v2700_v40 = vpop.xlane.xlu0 %850  ;;  %v611_v2 = vmul.f32 %v1775_v38, %v2433_v60  ;;  %v877_v36 = vsub.f32 %v2489_v16, %v2697_v34 }
 0x278   :  { %v1777_v0 = vpop.eup %1776 }
 0x279   :  { %v2704_v53 = vpop.xlane.xlu1 %852  ;;  %v620_v58 = vpack.c.bf16 %v611_v2, %v610_v42  ;;  %v612_v24 = vmul.f32 %v1777_v0, %v2418_v12  ;;  %v894_v0 = vmul.f32 1.442695, %v876_v59 }
 0x27a   :  { %v1779_v45 = vpop.eup %1778  ;;  %v879_v59 = vsub.f32 %v2503_v31, %v2704_v53 }
 0x27b   :  { %1690 = vmatprep.mubr.msk.bf16.mxu1 %vm68_vm0, %v620_v58  ;;  %v2707_v11 = vpop.xlane.xlu0 %854  ;;  %v613_v52 = vmul.f32 %v1779_v45, %v2430_v9 }
 0x27d   :  { %v2711_v56 = vpop.xlane.xlu1 %856  ;;  %v621_v18 = vpack.c.bf16 %v613_v52, %v612_v24  ;;  %v896_v52 = vmul.f32 1.442695, %v877_v36 }
 0x27e   :  { %v1781_v49 = vpop.eup %1780 }
 0x27f   :  { %1691 = vmatmul.mubr.msk.bf16.gmra.mrb[36].mxu1 %vm68_vm0, %v621_v18  ;;  %922 = vadd.xlane.f32.xlu0 %v1781_v49  ;;  %v2714_v19 = vpop.xlane.xlu0 %858  ;;  %v878_v49 = vsub.f32 %v2496_v30, %v2700_v40 }
 0x280   :  { %v1783_v60 = vpop.eup %1782 }
 0x281   :  { %v2716_v63 = vpop.xlane.xlu1 %860  ;;  %924 = vadd.xlane.f32.xlu1 %v1783_v60  ;;  %v898_v16 = vmul.f32 1.442695, %v878_v49 }
 0x283   :  { %v2718_v33 = vpop.xlane.xlu0 %862 }
 0x285   :  { %v2720_v13 = vpop.xlane.xlu1 %864 }
 0x287   :  { %v2722_v12 = vpop.xlane.xlu0 %866 }
 0x289   :  { %v2724_v9 = vpop.xlane.xlu1 %868 }
 0x28b   :  { %v2726_v51 = vpop.xlane.xlu0 %870 }
 0x28c   :  { %3181 = vst [vmem:[#allocation25_spill] sm:$0xff] %v2726_v51 }
 0x28d   :  { %v2728_v28 = vpop.xlane.xlu1 %872 }
 0x28e   :  { %3182 = vst [vmem:[#allocation26_spill] sm:$0xff] %v2728_v28 }
 0x28f   :  { %v2730_v54 = vpop.xlane.xlu0 %1018 }
 0x290   :  { %v1050_v21 = vsub.f32 %v2579_v27, %v2730_v54 }
 0x291   :  { %v2736_v22 = vpop.xlane.xlu1 %1020 }
 0x292   :  { %v1066_v38 = vmul.f32 1.442695, %v1050_v21  ;;  %v1051_v42 = vsub.f32 %v2585_v17, %v2736_v22 }
 0x293   :  { %v2742_v2 = vpop.xlane.xlu0 %1022 }
 0x294   :  { %1784 = vpow2.f32 %v1066_v38  ;;  %v1068_v58 = vmul.f32 1.442695, %v1051_v42  ;;  %v1052_v45 = vsub.f32 %v2591_v10, %v2742_v2 }
 0x295   :  { %v2746_v24 = vpop.xlane.xlu1 %1024 }
 0x296   :  { %1786 = vpow2.f32 %v1068_v58  ;;  %v1053_v18 = vsub.f32 %v2597_v20, %v2746_v24  ;;  %v1070_v60 = vmul.f32 1.442695, %v1052_v45 }
 0x297   :  { %1788 = vpow2.f32 %v894_v0  ;;  %v2752_v21 = vpop.xlane.xlu0 %1026  ;;  %v900_v0 = vmul.f32 1.442695, %v879_v59 }
 0x298   :  { %1790 = vpow2.f32 %v896_v52  ;;  %v1072_v38 = vmul.f32 1.442695, %v1053_v18  ;;  %v1054_v36 = vsub.f32 %v2603_v5, %v2752_v21  ;;  %v880_v52 = vsub.f32 %v2510_v35, %v2707_v11 }
 0x299   :  { %v2756_v42 = vpop.xlane.xlu1 %1028  ;;  %1792 = vpow2.f32 %v1070_v60  ;;  %v881_v60 = vsub.f32 %v2517_v37, %v2711_v56 }
 0x29a   :  { %1794 = vpow2.f32 %v1072_v38  ;;  %v1055_v45 = vsub.f32 %v2609_v6, %v2756_v42  ;;  %v1074_v18 = vmul.f32 1.442695, %v1054_v36 }
 0x29b   :  { %1796 = vpow2.f32 %v898_v16  ;;  %v2764_v31 = vpop.xlane.xlu0 %1030  ;;  %v904_v35 = vmul.f32 1.442695, %v881_v60 }
 0x29c   :  { %1798 = vpow2.f32 %v900_v0  ;;  %v1076_v59 = vmul.f32 1.442695, %v1055_v45  ;;  %v1056_v16 = vsub.f32 %v2615_v8, %v2764_v31  ;;  %v882_v45 = vsub.f32 %v2524_v39, %v2714_v19 }
 0x29d   :  { %v2768_v38 = vpop.xlane.xlu1 %1032  ;;  %1800 = vpow2.f32 %v1074_v18 }
 0x29e   :  { %v1785_v58 = vpop.eup %1784  ;;  %1802 = vpow2.f32 %v1076_v59 }
 0x29f   :  { %1098 = vadd.xlane.f32.xlu0 %v1785_v58  ;;  %v902_v58 = vmul.f32 1.442695, %v880_v52  ;;  %v2776_v37 = vpop.xlane.xlu0 %1034 }
 0x2a0   :  { %v1787_v30 = vpop.eup %1786 }
 0x2a1   :  { %1100 = vadd.xlane.f32.xlu1 %v1787_v30  ;;  %v1789_v49 = vpop.eup %1788  ;;  %v1057_v30 = vsub.f32 %v2621_v43, %v2768_v38  ;;  %1804 = vpow2.f32 %v902_v58  ;;  %v2780_v60 = vpop.xlane.xlu1 %1036  ;;  %v1058_v58 = vsub.f32 %v2627_v32, %v2776_v37 }
 0x2a2   :  { %v1791_v6 = vpop.eup %1790  ;;  %1806 = vpow2.f32 %v904_v35  ;;  %v1059_v35 = vsub.f32 %v2633_v26, %v2780_v60 }
 0x2a3   :  { %926 = vadd.xlane.f32.xlu0 %v1789_v49  ;;  %v1793_v36 = vpop.eup %1792  ;;  %v1078_v49 = vmul.f32 1.442695, %v1056_v16  ;;  %v1080_v18 = vmul.f32 1.442695, %v1057_v30  ;;  %v884_v30 = vsub.f32 %v2539_v23, %v2718_v33 }
 0x2a4   :  { %v1795_v0 = vpop.eup %1794 }
 0x2a5   :  { %928 = vadd.xlane.f32.xlu1 %v1791_v6  ;;  %v1797_v52 = vpop.eup %1796  ;;  %v883_v6 = vsub.f32 %v2531_v41, %v2716_v63  ;;  %1808 = vpow2.f32 %v1078_v49  ;;  %v2788_v41 = vpop.xlane.xlu0 %1038  ;;  %v885_v49 = vsub.f32 %v2548_v25, %v2720_v13 }
 0x2a6   :  { %v1799_v59 = vpop.eup %1798  ;;  %1810 = vpow2.f32 %v1080_v18  ;;  %v2792_v18 = vpop.xlane.xlu1 %1040 }
 0x2a7   :  { %1102 = vadd.xlane.f32.xlu0 %v1793_v36  ;;  %v906_v36 = vmul.f32 1.442695, %v882_v45  ;;  %v1801_v16 = vpop.eup %1800  ;;  %v908_v39 = vmul.f32 1.442695, %v883_v6  ;;  %v1084_v6 = vmul.f32 1.442695, %v1059_v35  ;;  %v886_v35 = vsub.f32 %v2554_v62, %v2722_v12 }
 0x2a8   :  { %v912_v23 = vmul.f32 1.442695, %v885_v49 }
 0x2a9   :  { %1104 = vadd.xlane.f32.xlu1 %v1795_v0  ;;  %v1803_v0 = vpop.eup %1802  ;;  %1812 = vpow2.f32 %v906_v36  ;;  %v1060_v36 = vsub.f32 %v2639_v4, %v2788_v41  ;;  %v2800_v25 = vpop.xlane.xlu0 %1042 }
 0x2aa   :  { %1814 = vpow2.f32 %v908_v39  ;;  %v1061_v39 = vsub.f32 %v2645_v57, %v2792_v18 }
 0x2ab   :  { %930 = vadd.xlane.f32.xlu0 %v1797_v52  ;;  %v1082_v52 = vmul.f32 1.442695, %v1058_v58  ;;  %v1805_v45 = vpop.eup %1804 }
 0x2ac   :  { %v1088_v49 = vmul.f32 1.442695, %v1061_v39  ;;  %v888_v39 = vsub.f32 %v2565_v14, %v2726_v51 }
 0x2ad   :  { %932 = vadd.xlane.f32.xlu1 %v1799_v59  ;;  %v1807_v59 = vpop.eup %1806  ;;  %1816 = vpow2.f32 %v1082_v52  ;;  %v887_v52 = vsub.f32 %v2561_v3, %v2724_v9  ;;  %v2812_v3 = vpop.xlane.xlu0 %1046 }
 0x2ae   :  { %1818 = vpow2.f32 %v1084_v6  ;;  %v2804_v6 = vpop.xlane.xlu1 %1044  ;;  %3184 = vst [vmem:[#allocation28_spill] sm:$0xff] %v2812_v3 }
 0x2af   :  { %1106 = vadd.xlane.f32.xlu0 %v1801_v16  ;;  %v910_v16 = vmul.f32 1.442695, %v884_v30  ;;  %v1809_v58 = vpop.eup %1808  ;;  %3183 = vst [vmem:[#allocation27_spill] sm:$0xff] %v2804_v6  ;;  %v916_v62 = vmul.f32 1.442695, %v887_v52 }
 0x2b1   :  { %1108 = vadd.xlane.f32.xlu1 %v1803_v0  ;;  %v1811_v0 = vpop.eup %1810  ;;  %1820 = vpow2.f32 %v910_v16  ;;  %v1062_v16 = vsub.f32 %v2651_v29, %v2800_v25 }
 0x2b2   :  { %1822 = vpow2.f32 %v912_v23  ;;  %v1063_v23 = vsub.f32 %v2657_v48, %v2804_v6 }
 0x2b3   :  { %934 = vadd.xlane.f32.xlu0 %v1805_v45  ;;  %v1086_v45 = vmul.f32 1.442695, %v1060_v36  ;;  %v1813_v30 = vpop.eup %1812 }
 0x2b4   :  { %v1092_v52 = vmul.f32 1.442695, %v1063_v23 }
 0x2b5   :  { %936 = vadd.xlane.f32.xlu1 %v1807_v59  ;;  %v1815_v59 = vpop.eup %1814  ;;  %1824 = vpow2.f32 %v1086_v45  ;;  %v889_v45 = vsub.f32 %v2573_v50, %v2728_v28 }
 0x2b6   :  { %1826 = vpow2.f32 %v1088_v49  ;;  %v2816_v49 = vpop.xlane.xlu1 %1048 }
 0x2b7   :  { %1110 = vadd.xlane.f32.xlu0 %v1809_v58  ;;  %v914_v58 = vmul.f32 1.442695, %v886_v35  ;;  %v1817_v36 = vpop.eup %1816  ;;  %3185 = vst [vmem:[#allocation29_spill] sm:$0xff] %v2816_v49  ;;  %v920_v14 = vmul.f32 1.442695, %v889_v45 }
 0x2b9   :  { %1112 = vadd.xlane.f32.xlu1 %v1811_v0  ;;  %v1819_v0 = vpop.eup %1818  ;;  %1828 = vpow2.f32 %v914_v58  ;;  %v1064_v58 = vsub.f32 %v2662_v46, %v2812_v3 }
 0x2ba   :  { %1830 = vpow2.f32 %v916_v62  ;;  %v1065_v62 = vsub.f32 %v2667_v47, %v2816_v49 }
 0x2bb   :  { %938 = vadd.xlane.f32.xlu0 %v1813_v30  ;;  %v1090_v30 = vmul.f32 1.442695, %v1062_v16  ;;  %v1821_v35 = vpop.eup %1820  ;;  %v1094_v23 = vmul.f32 1.442695, %v1064_v58 }
 0x2bd   :  { %940 = vadd.xlane.f32.xlu1 %v1815_v59  ;;  %v1823_v59 = vpop.eup %1822  ;;  %1832 = vpow2.f32 %v1090_v30 }
 0x2be   :  { %1834 = vpow2.f32 %v1092_v52 }
 0x2bf   :  { %1114 = vadd.xlane.f32.xlu0 %v1817_v36  ;;  %v918_v36 = vmul.f32 1.442695, %v888_v39  ;;  %v1825_v16 = vpop.eup %1824 }
 0x2c1   :  { %1116 = vadd.xlane.f32.xlu1 %v1819_v0  ;;  %v1827_v0 = vpop.eup %1826  ;;  %1836 = vpow2.f32 %v918_v36 }
 0x2c2   :  { %1838 = vpow2.f32 %v920_v14 }
 0x2c3   :  { %942 = vadd.xlane.f32.xlu0 %v1821_v35  ;;  %v1829_v50 = vpop.eup %1828  ;;  %v1096_v35 = vmul.f32 1.442695, %v1065_v62  ;;  %1840 = vpow2.f32 %v1094_v23 }
 0x2c4   :  { %v1831_v39 = vpop.eup %1830 }
 0x2c5   :  { %944 = vadd.xlane.f32.xlu1 %v1823_v59  ;;  %1842 = vpow2.f32 %v1096_v35 }
 0x2c7   :  { %1118 = vadd.xlane.f32.xlu0 %v1825_v16  ;;  %v1833_v30 = vpop.eup %1832 }
 0x2c8   :  { %v1835_v45 = vpop.eup %1834 }
 0x2c9   :  { %1120 = vadd.xlane.f32.xlu1 %v1827_v0 }
 0x2cb   :  { %946 = vadd.xlane.f32.xlu0 %v1829_v50  ;;  %v1837_v52 = vpop.eup %1836 }
 0x2cc   :  { %v1839_v59 = vpop.eup %1838 }
 0x2cd   :  { %948 = vadd.xlane.f32.xlu1 %v1831_v39  ;;  %v1841_v16 = vpop.eup %1840 }
 0x2cf   :  { %1122 = vadd.xlane.f32.xlu0 %v1833_v30  ;;  %v1843_v36 = vpop.eup %1842 }
 0x2d1   :  { %1124 = vadd.xlane.f32.xlu1 %v1835_v45 }
 0x2d3   :  { %950 = vadd.xlane.f32.xlu0 %v1837_v52 }
 0x2d5   :  { %952 = vadd.xlane.f32.xlu1 %v1839_v59 }
 0x2d7   :  { %1126 = vadd.xlane.f32.xlu0 %v1841_v16 }
 0x2d9   :  { %1128 = vadd.xlane.f32.xlu1 %v1843_v36 }
 0x30c   :  { %v923_v58 = vpop.xlane.xlu0 %922 }
 0x30d   :  { %1844 = vlog2.f32 %v923_v58 }
 0x30e   :  { %v925_v14 = vpop.xlane.xlu1 %924 }
 0x317   :  { %v1845_v39 = vpop.eup %1844 }
 0x32c   :  { %v1099_v50 = vpop.xlane.xlu0 %1098 }
 0x32d   :  { %1846 = vlog2.f32 %v1099_v50 }
 0x32e   :  { %1848 = vlog2.f32 %v925_v14  ;;  %v1101_v62 = vpop.xlane.xlu1 %1100 }
 0x32f   :  { %1850 = vlog2.f32 %v1101_v62  ;;  %v955_v62 = vmul.f32 0.6931472, %v1845_v39 }
 0x330   :  { %v927_v0 = vpop.xlane.xlu0 %926 }
 0x331   :  { %1852 = vlog2.f32 %v927_v0 }
 0x332   :  { %v929_v23 = vpop.xlane.xlu1 %928 }
 0x333   :  { %1854 = vlog2.f32 %v929_v23 }
 0x334   :  { %v1103_v35 = vpop.xlane.xlu0 %1102 }
 0x335   :  { %1856 = vlog2.f32 %v1103_v35 }
 0x336   :  { %v1105_v30 = vpop.xlane.xlu1 %1104 }
 0x337   :  { %v1847_v45 = vpop.eup %1846  ;;  %1858 = vlog2.f32 %v1105_v30 }
 0x338   :  { %v1849_v52 = vpop.eup %1848  ;;  %v931_v59 = vpop.xlane.xlu0 %930  ;;  %v1131_v36 = vmul.f32 0.6931472, %v1847_v45 }
 0x339   :  { %v1851_v16 = vpop.eup %1850  ;;  %v957_v49 = vmul.f32 0.6931472, %v1849_v52  ;;  %1860 = vlog2.f32 %v931_v59  ;;  %v986_v52 = vadd.f32 %v955_v62, %v2682_v44 }
 0x33a   :  { %v1133_v58 = vmul.f32 0.6931472, %v1851_v16  ;;  %v933_v47 = vpop.xlane.xlu1 %932  ;;  %v2822_v50 = vpop.f32.mrb[24].mxu1  ;;  %v1162_v30 = vadd.f32 %v1131_v36, %v2730_v54 }
 0x33b   :  { %v1853_v14 = vpop.eup %1852  ;;  %v2824_v0 = vpop.f32.mrb[25].mxu1 }
 0x33c   :  { %v959_v23 = vmul.f32 0.6931472, %v1853_v14  ;;  %v2826_v35 = vpop.f32.mrb[26].mxu1  ;;  %v1107_v46 = vpop.xlane.xlu0 %1106  ;;  %v1163_v28 = vadd.f32 %v1133_v58, %v2736_v22  ;;  %v987_v14 = vadd.f32 %v957_v49, %v2688_v7  ;;  %v1178_v54 = vsub.f32 %v2579_v27, %v1162_v30 }
 0x33d   :  { %v1855_v3 = vpop.eup %1854  ;;  %1862 = vlog2.f32 %v1107_v46  ;;  %v2830_v45 = vpop.f32.mrb[27].mxu1  ;;  %v1002_v7 = vsub.f32 %v2465_v61, %v986_v52 }
 0x33e   :  { %v961_v16 = vmul.f32 0.6931472, %v1855_v3  ;;  %1864 = vlog2.f32 %v933_v47  ;;  %v1109_v51 = vpop.xlane.xlu1 %1108  ;;  %v988_v59 = vadd.f32 %v959_v23, %v2693_v55  ;;  %v1179_v46 = vsub.f32 %v2585_v17, %v1163_v28 }
 0x33f   :  { %v1857_v39 = vpop.eup %1856  ;;  %1866 = vlog2.f32 %v1109_v51  ;;  %v1003_v55 = vsub.f32 %v2475_v1, %v987_v14  ;;  %v2855_v1 = vstv %s3127_s0  ;;  %s1997_s0 = smov [#allocation3]  }
 0x340   :  { %v1135_v48 = vmul.f32 0.6931472, %v1857_v39  ;;  %v935_v6 = vpop.xlane.xlu0 %934  ;;  %v989_v3 = vadd.f32 %v961_v16, %v2697_v34  ;;  %v1004_v17 = vsub.f32 %v2482_v15, %v988_v59  ;;  %s1541_s21 = sshll.u32 %s1997_s0, 4  ;;  %s1542_s21 = int_to_ptr.vmem [resolvable:$true] %s1541_s21 }
 0x341   :  { %v1859_v29 = vpop.eup %1858  ;;  %1868 = vlog2.f32 %v935_v6  ;;  %s1972_s1 = scalar_lea.vmem %s1542_s21, 2048  ;;  %p1977_p1 = scmp.lt.s32.totalorder %s1542_s21, %s1542_s21 }
 0x342   :  { %v1164_v47 = vadd.f32 %v1135_v48, %v2742_v2  ;;  %v1137_v22 = vmul.f32 0.6931472, %v1859_v29  ;;  %v937_v36 = vpop.xlane.xlu1 %936  ;;  %v2839_v44 = vpop.f32.mrb[28].mxu1  ;;  %v1194_v29 = vadd.f32 %v1178_v54, %v1002_v7  ;;  %v1195_v2 = vadd.f32 %v1179_v46, %v1003_v55  ;;  %p1973_p0 = scmp.ne.s32.totalorder %s1542_s21, %s1972_s1  ;;  %p1978_p2 = scmp.lt.s32.totalorder %s1972_s1, %s1972_s1 }
 0x343   :  { %1870 = vlog2.f32 %v937_v36  ;;  %v2843_v51 = vpop.f32.mrb[29].mxu1  ;;  %v1861_v61 = vpop.eup %1860 }
 0x344   :  { %v1165_v27 = vadd.f32 %v1137_v22, %v2746_v24  ;;  %v1180_v28 = vsub.f32 %v2591_v10, %v1164_v47  ;;  %v2848_v34 = vpop.f32.mrb[30].mxu1  ;;  %v1111_v48 = vpop.xlane.xlu0 %1110  ;;  %v3186_v24 = vld [vmem:[#allocation7_spill] sm:$0xff]  ;;  %v1211_v59 = vmul.f32 %v2855_v1, %v1194_v29  ;;  %v1212_v54 = vmul.f32 %v2855_v1, %v1195_v2  ;;  %p1979_p3 = por %p1978_p2, %p1977_p1 }
 0x345   :  { %1872 = vlog2.f32 %v1111_v48  ;;  %v2850_v6 = vpop.f32.mrb[31].mxu1  ;;  %v1005_v58 = vsub.f32 %v3186_v24, %v989_v3  ;;  %v963_v46 = vmul.f32 0.6931472, %v1861_v61 }
 0x346   :  { %v1196_v49 = vadd.f32 %v1180_v28, %v1004_v17  ;;  %v1181_v15 = vsub.f32 %v2597_v20, %v1165_v27  ;;  %v1113_v10 = vpop.xlane.xlu1 %1112  ;;  %v1298_v61 = vadd.f32 %v2824_v0, %v1211_v59  ;;  %p1980_p4 = pnand %p1979_p3, %p1973_p0 }
 0x347   :  { %v1863_v62 = vpop.eup %1862  ;;  %1874 = vlog2.f32 %v1113_v10 }
 0x348   :  { %v1865_v23 = vpop.eup %1864  ;;  %v1213_v30 = vmul.f32 %v2855_v1, %v1196_v49  ;;  %v1197_v16 = vadd.f32 %v1181_v15, %v1005_v58  ;;  %v1139_v39 = vmul.f32 0.6931472, %v1863_v62  ;;  %v939_v52 = vpop.xlane.xlu0 %938  ;;  %v990_v15 = vadd.f32 %v963_v46, %v2700_v40 }
 0x349   :  { %v1867_v14 = vpop.eup %1866  ;;  %v965_v55 = vmul.f32 0.6931472, %v1865_v23  ;;  %1876 = vlog2.f32 %v939_v52  ;;  %v2893_v52 = vsel %vm809_vm2, %v1298_v61, -1e+30 }
 0x34a   :  { %v1306_v47 = vadd.f32 %v2822_v50, %v1213_v30  ;;  %v1214_v3 = vmul.f32 %v2855_v1, %v1197_v16  ;;  %v1141_v20 = vmul.f32 0.6931472, %v1867_v14  ;;  %v941_v22 = vpop.xlane.xlu1 %940  ;;  %v2864_v36 = vpop.f32.mrb[32].mxu1  ;;  %v1166_v28 = vadd.f32 %v1139_v39, %v2752_v21 }
 0x34b   :  { %v1869_v7 = vpop.eup %1868  ;;  %v2866_v27 = vpop.f32.mrb[33].mxu1  ;;  %v991_v0 = vadd.f32 %v965_v55, %v2704_v53  ;;  %v3188_v53 = vld [vmem:[#allocation8_spill] sm:$0xff] }
 0x34c   :  { %v1309_v17 = vadd.f32 %v2826_v35, %v1214_v3  ;;  %v967_v48 = vmul.f32 0.6931472, %v1869_v7  ;;  %v2870_v29 = vpop.f32.mrb[34].mxu1  ;;  %v1115_v2 = vpop.xlane.xlu0 %1114  ;;  %v2877_v58 = vsel %vm809_vm2, %v1306_v47, -1e+30  ;;  %v1301_v35 = vadd.f32 %v2830_v45, %v1212_v54  ;;  %v3189_v54 = vld [vmem:[#allocation20_spill] sm:$0xff] }
 0x34d   :  { %v1871_v50 = vpop.eup %1870  ;;  %1878 = vlog2.f32 %v1115_v2  ;;  %v2873_v49 = vpop.f32.mrb[35].mxu1  ;;  %v1167_v21 = vadd.f32 %v1141_v20, %v2756_v42  ;;  %1380 = vmax.xlane.f32.xlu0 %v2877_v58  ;;  %v1182_v40 = vsub.f32 %v2603_v5, %v1166_v28  ;;  %v1006_v14 = vsub.f32 %v3188_v53, %v990_v15  ;;  %v3190_v20 = vld [vmem:[#allocation9_spill] sm:$0xff] }
 0x34e   :  { %1880 = vlog2.f32 %v941_v22  ;;  %v1117_v10 = vpop.xlane.xlu1 %1116  ;;  %v969_v23 = vmul.f32 0.6931472, %v1871_v50  ;;  %v2886_v30 = vsel %vm809_vm2, %v1309_v17, -1e+30  ;;  %v992_v16 = vadd.f32 %v967_v48, %v2707_v11 }
 0x34f   :  { %v1873_v62 = vpop.eup %1872  ;;  %1882 = vlog2.f32 %v1117_v10  ;;  %1382 = vmax.xlane.f32.xlu1 %v2886_v30  ;;  %v1183_v46 = vsub.f32 %v3189_v54, %v1167_v21  ;;  %v1007_v22 = vsub.f32 %v3190_v20, %v991_v0  ;;  %v2905_v7 = vsel %vm809_vm2, %v1301_v35, -1e+30 }
 0x350   :  { %v1143_v45 = vmul.f32 0.6931472, %v1873_v62  ;;  %v943_v42 = vpop.xlane.xlu0 %942  ;;  %v993_v3 = vadd.f32 %v969_v23, %v2711_v56  ;;  %v1198_v28 = vadd.f32 %v1182_v40, %v1006_v14  ;;  %v3192_v23 = vld [vmem:[#allocation11_spill] sm:$0xff] }
 0x351   :  { %v1875_v39 = vpop.eup %1874  ;;  %1884 = vlog2.f32 %v943_v42  ;;  %1376 = vmax.xlane.f32.xlu0 %v2893_v52  ;;  %v1199_v35 = vadd.f32 %v1183_v46, %v1007_v22 }
 0x352   :  { %v1168_v59 = vadd.f32 %v1143_v45, %v2764_v31  ;;  %v1145_v47 = vmul.f32 0.6931472, %v1875_v39  ;;  %v945_v5 = vpop.xlane.xlu1 %944  ;;  %v2899_v11 = vpop.f32.mrb[36].mxu1  ;;  %v3191_v31 = vld [vmem:[#allocation10_spill] sm:$0xff] }
 0x353   :  { %1886 = vlog2.f32 %v945_v5  ;;  %v2907_v55 = vpop.f32.mrb[37].mxu1  ;;  %v1008_v17 = vsub.f32 %v3191_v31, %v992_v16  ;;  %1378 = vmax.xlane.f32.xlu1 %v2905_v7  ;;  %v1877_v61 = vpop.eup %1876  ;;  %v1009_v16 = vsub.f32 %v3192_v23, %v993_v3 }
 0x354   :  { %v1184_v48 = vsub.f32 %v2615_v8, %v1168_v59  ;;  %v1169_v2 = vadd.f32 %v1145_v47, %v2768_v38  ;;  %v2913_v50 = vpop.f32.mrb[38].mxu1  ;;  %v1119_v56 = vpop.xlane.xlu0 %1118  ;;  %v1215_v38 = vmul.f32 %v2855_v1, %v1198_v28  ;;  %v971_v40 = vmul.f32 0.6931472, %v1877_v61 }
 0x355   :  { %1888 = vlog2.f32 %v1119_v56  ;;  %v2915_v15 = vpop.f32.mrb[39].mxu1  ;;  %v1216_v59 = vmul.f32 %v2855_v1, %v1199_v35 }
 0x356   :  { %v1185_v21 = vsub.f32 %v2621_v43, %v1169_v2  ;;  %v1121_v10 = vpop.xlane.xlu1 %1120  ;;  %v1200_v62 = vadd.f32 %v1184_v48, %v1008_v17  ;;  %v1314_v22 = vadd.f32 %v2843_v51, %v1215_v38  ;;  %v994_v31 = vadd.f32 %v971_v40, %v2714_v19 }
 0x357   :  { %v1879_v0 = vpop.eup %1878  ;;  %1890 = vlog2.f32 %v1121_v10  ;;  %v1317_v2 = vadd.f32 %v2850_v6, %v1216_v59 }
 0x358   :  { %v1881_v8 = vpop.eup %1880  ;;  %v1147_v45 = vmul.f32 0.6931472, %v1879_v0  ;;  %v947_v42 = vpop.xlane.xlu0 %946  ;;  %v1217_v39 = vmul.f32 %v2855_v1, %v1200_v62  ;;  %v1201_v14 = vadd.f32 %v1185_v21, %v1009_v16  ;;  %v3193_v62 = vld [vmem:[#allocation12_spill] sm:$0xff] }
 0x359   :  { %v1883_v53 = vpop.eup %1882  ;;  %1892 = vlog2.f32 %v947_v42  ;;  %v973_v3 = vmul.f32 0.6931472, %v1881_v8  ;;  %v1010_v0 = vsub.f32 %v3193_v62, %v994_v31  ;;  %v3196_v31 = vld [vmem:[#allocation15_spill] sm:$0xff] }
 0x35a   :  { %v1170_v43 = vadd.f32 %v1147_v45, %v2776_v37  ;;  %v1149_v54 = vmul.f32 0.6931472, %v1883_v53  ;;  %v949_v46 = vpop.xlane.xlu1 %948  ;;  %v1322_v47 = vadd.f32 %v2839_v44, %v1217_v39  ;;  %v1218_v20 = vmul.f32 %v2855_v1, %v1201_v14  ;;  %v3194_v45 = vld [vmem:[#allocation13_spill] sm:$0xff]  ;;  %v3195_v14 = vld [vmem:[#allocation14_spill] sm:$0xff] }
 0x35b   :  { %v1885_v5 = vpop.eup %1884  ;;  %1894 = vlog2.f32 %v949_v46  ;;  %v995_v35 = vadd.f32 %v973_v3, %v2716_v63  ;;  %v2955_v53 = vsel %vm809_vm2, %v1317_v2, -1e+30 }
 0x35c   :  { %v975_v17 = vmul.f32 0.6931472, %v1885_v5  ;;  %v1123_v28 = vpop.xlane.xlu0 %1122  ;;  %v2929_v48 = vsel %vm809_vm2, %v1322_v47, -1e+30  ;;  %v1325_v44 = vadd.f32 %v2848_v34, %v1218_v20  ;;  %v1186_v56 = vsub.f32 %v2627_v32, %v1170_v43 }
 0x35d   :  { %v1887_v37 = vpop.eup %1886  ;;  %1896 = vlog2.f32 %v1123_v28  ;;  %1388 = vmax.xlane.f32.xlu0 %v2929_v48  ;;  %v1171_v51 = vadd.f32 %v1149_v54, %v2780_v60  ;;  %v2946_v60 = vsel %vm809_vm2, %v1314_v22, -1e+30  ;;  %v1011_v42 = vsub.f32 %v3194_v45, %v995_v35  ;;  %v3197_v35 = vld [vmem:[#allocation16_spill] sm:$0xff] }
 0x35e   :  { %v1125_v61 = vpop.xlane.xlu1 %1124  ;;  %v977_v21 = vmul.f32 0.6931472, %v1887_v37  ;;  %v2939_v10 = vsel %vm809_vm2, %v1325_v44, -1e+30  ;;  %v996_v34 = vadd.f32 %v975_v17, %v2718_v33  ;;  %v1202_v40 = vadd.f32 %v1186_v56, %v1010_v0 }
 0x35f   :  { %v1889_v19 = vpop.eup %1888  ;;  %1898 = vlog2.f32 %v1125_v61  ;;  %1390 = vmax.xlane.f32.xlu1 %v2939_v10  ;;  %v1187_v63 = vsub.f32 %v2633_v26, %v1171_v51 }
 0x360   :  { %v1151_v23 = vmul.f32 0.6931472, %v1889_v19  ;;  %v951_v32 = vpop.xlane.xlu0 %950  ;;  %v997_v39 = vadd.f32 %v977_v21, %v2720_v13  ;;  %v1012_v59 = vsub.f32 %v3195_v14, %v996_v34  ;;  %v1219_v3 = vmul.f32 %v2855_v1, %v1202_v40  ;;  %v3198_v34 = vld [vmem:[#allocation21_spill] sm:$0xff] }
 0x361   :  { %v1891_v6 = vpop.eup %1890  ;;  %1900 = vlog2.f32 %v951_v32  ;;  %1384 = vmax.xlane.f32.xlu0 %v2946_v60  ;;  %v1203_v20 = vadd.f32 %v1187_v63, %v1011_v42  ;;  %v3199_v32 = vld [vmem:[#allocation27_spill] sm:$0xff]  ;;  %v3202_v14 = vld [vmem:[#allocation25_spill] sm:$0xff] }
 0x362   :  { %v1172_v16 = vadd.f32 %v1151_v23, %v2788_v41  ;;  %v1153_v8 = vmul.f32 0.6931472, %v1891_v6  ;;  %v953_v38 = vpop.xlane.xlu1 %952  ;;  %v1013_v17 = vsub.f32 %v3196_v31, %v997_v39  ;;  %v1330_v61 = vadd.f32 %v2866_v27, %v1219_v3  ;;  %v3205_v31 = vld [vmem:[#allocation18_spill] sm:$0xff] }
 0x363   :  { %v1893_v33 = vpop.eup %1892  ;;  %1902 = vlog2.f32 %v953_v38  ;;  %1386 = vmax.xlane.f32.xlu1 %v2955_v53  ;;  %v1220_v0 = vmul.f32 %v2855_v1, %v1203_v20 }
 0x364   :  { %v1188_v43 = vsub.f32 %v2639_v4, %v1172_v16  ;;  %v1173_v26 = vadd.f32 %v1153_v8, %v2792_v18  ;;  %v979_v41 = vmul.f32 0.6931472, %v1893_v33  ;;  %v1127_v54 = vpop.xlane.xlu0 %1126  ;;  %v3200_v16 = vld [vmem:[#allocation22_spill] sm:$0xff]  ;;  %v3201_v33 = vld [vmem:[#allocation17_spill] sm:$0xff] }
 0x365   :  { %v1895_v46 = vpop.eup %1894  ;;  %1904 = vlog2.f32 %v1127_v54  ;;  %v1333_v39 = vadd.f32 %v2873_v49, %v1220_v0 }
 0x366   :  { %v1189_v47 = vsub.f32 %v2645_v57, %v1173_v26  ;;  %v1129_v13 = vpop.xlane.xlu1 %1128  ;;  %v1204_v5 = vadd.f32 %v1188_v43, %v1012_v59  ;;  %v998_v4 = vadd.f32 %v979_v41, %v2722_v12  ;;  %v981_v28 = vmul.f32 0.6931472, %v1895_v46  ;;  %v3203_v46 = vld [vmem:[#allocation26_spill] sm:$0xff] }
 0x367   :  { %v1897_v22 = vpop.eup %1896  ;;  %1906 = vlog2.f32 %v1129_v13  ;;  %v3204_v13 = vld [vmem:[#allocation28_spill] sm:$0xff]  ;;  %v3001_v20 = vsel %vm809_vm2, %v1333_v39, -1e+30 }
 0x368   :  { %v1155_v18 = vmul.f32 0.6931472, %v1897_v22  ;;  %v1221_v37 = vmul.f32 %v2855_v1, %v1204_v5  ;;  %v1205_v2 = vadd.f32 %v1189_v47, %v1013_v17  ;;  %v1014_v21 = vsub.f32 %v3197_v35, %v998_v4  ;;  %v3206_v4 = vld [vmem:[#allocation23_spill] sm:$0xff] }
 0x369   :  { %v1899_v44 = vpop.eup %1898  ;;  %v999_v62 = vadd.f32 %v981_v28, %v2724_v9 }
 0x36a   :  { %v1174_v56 = vadd.f32 %v1155_v18, %v2800_v25  ;;  %v1157_v57 = vmul.f32 0.6931472, %v1899_v44  ;;  %v1338_v51 = vadd.f32 %v2864_v36, %v1221_v37  ;;  %v1222_v12 = vmul.f32 %v2855_v1, %v1205_v2  ;;  %v3207_v18 = vld [vmem:[#allocation29_spill] sm:$0xff]  ;;  %v3208_v2 = vld [vmem:[#allocation19_spill] sm:$0xff] }
 0x36b   :  { %v1901_v19 = vpop.eup %1900  ;;  %v1015_v45 = vsub.f32 %v3201_v33, %v999_v62 }
 0x36c   :  { %v1190_v23 = vsub.f32 %v3198_v34, %v1174_v56  ;;  %v1175_v6 = vadd.f32 %v1157_v57, %v3199_v32  ;;  %v983_v63 = vmul.f32 0.6931472, %v1901_v19  ;;  %v2977_v25 = vsel %vm809_vm2, %v1338_v51, -1e+30  ;;  %v3209_v57 = vld [vmem:[#allocation24_spill] sm:$0xff] }
 0x36d   :  { %v1903_v36 = vpop.eup %1902  ;;  %1396 = vmax.xlane.f32.xlu0 %v2977_v25  ;;  %v1341_v27 = vadd.f32 %v2870_v29, %v1222_v12  ;;  %v2992_v29 = vsel %vm809_vm2, %v1330_v61, -1e+30 }
 0x36e   :  { %v1191_v9 = vsub.f32 %v3200_v16, %v1175_v6  ;;  %v985_v8 = vmul.f32 0.6931472, %v1903_v36  ;;  %v1206_v38 = vadd.f32 %v1190_v23, %v1014_v21  ;;  %v1000_v59 = vadd.f32 %v983_v63, %v3202_v14 }
 0x36f   :  { %v1905_v40 = vpop.eup %1904  ;;  %v2985_v42 = vsel %vm809_vm2, %v1341_v27, -1e+30 }
 0x370   :  { %v1159_v43 = vmul.f32 0.6931472, %v1905_v40  ;;  %1398 = vmax.xlane.f32.xlu1 %v2985_v42  ;;  %v1223_v26 = vmul.f32 %v2855_v1, %v1206_v38  ;;  %v1207_v54 = vadd.f32 %v1191_v9, %v1015_v45  ;;  %v1001_v47 = vadd.f32 %v985_v8, %v3203_v46 }
 0x371   :  { %v1907_v41 = vpop.eup %1906  ;;  %1392 = vmax.xlane.f32.xlu0 %v2992_v29  ;;  %v1016_v17 = vsub.f32 %v3205_v31, %v1000_v59 }
 0x372   :  { %v1176_v5 = vadd.f32 %v1159_v43, %v3204_v13  ;;  %v1161_v49 = vmul.f32 0.6931472, %v1907_v41  ;;  %v1346_v3 = vadd.f32 %v2907_v55, %v1223_v26  ;;  %v1224_v22 = vmul.f32 %v2855_v1, %v1207_v54 }
 0x373   :  { %v1017_v56 = vsub.f32 %v3208_v2, %v1001_v47 }
 0x374   :  { %v1192_v28 = vsub.f32 %v3206_v4, %v1176_v5  ;;  %v1177_v37 = vadd.f32 %v1161_v49, %v3207_v18  ;;  %1394 = vmax.xlane.f32.xlu1 %v3001_v20  ;;  %v3010_v44 = vsel %vm809_vm2, %v1346_v3, -1e+30  ;;  %v1349_v55 = vadd.f32 %v2915_v15, %v1224_v22 }
 0x375   :  { %1400 = vmax.xlane.f32.xlu0 %v3010_v44 }
 0x376   :  { %v1193_v51 = vsub.f32 %v3209_v57, %v1177_v37  ;;  %v1208_v61 = vadd.f32 %v1192_v28, %v1016_v17  ;;  %v3018_v19 = vsel %vm809_vm2, %v1349_v55, -1e+30 }
 0x378   :  { %1402 = vmax.xlane.f32.xlu1 %v3018_v19  ;;  %v1225_v35 = vmul.f32 %v2855_v1, %v1208_v61  ;;  %v1209_v21 = vadd.f32 %v1193_v51, %v1017_v56 }
 0x37a   :  { %v1354_v62 = vadd.f32 %v2899_v11, %v1225_v35  ;;  %v1226_v12 = vmul.f32 %v2855_v1, %v1209_v21 }
 0x37c   :  { %v3026_v15 = vsel %vm809_vm2, %v1354_v62, -1e+30  ;;  %v1357_v0 = vadd.f32 %v2913_v50, %v1226_v12 }
 0x37d   :  { %1404 = vmax.xlane.f32.xlu0 %v3026_v15 }
 0x37e   :  { %v3032_v34 = vsel %vm809_vm2, %v1357_v0, -1e+30 }
 0x37f   :  { %1406 = vmax.xlane.f32.xlu1 %v3032_v34 }
 0x3da   :  { %v1381_v23 = vpop.xlane.xlu0 %1380 }
 0x3db   :  { %v1410_v32 = vsub.f32 %v2877_v58, %v1381_v23 }
 0x3dc   :  { %v1383_v11 = vpop.xlane.xlu1 %1382 }
 0x3dd   :  { %v1428_v6 = vmul.f32 1.442695, %v1410_v32  ;;  %v1411_v1 = vsub.f32 %v2886_v30, %v1383_v11 }
 0x3de   :  { %v1377_v63 = vpop.xlane.xlu0 %1376 }
 0x3df   :  { %1908 = vpow2.f32 %v1428_v6  ;;  %v1430_v36 = vmul.f32 1.442695, %v1411_v1  ;;  %v1408_v50 = vsub.f32 %v2893_v52, %v1377_v63 }
 0x3e0   :  { %v1379_v27 = vpop.xlane.xlu1 %1378 }
 0x3e1   :  { %1910 = vpow2.f32 %v1430_v36  ;;  %v1424_v16 = vmul.f32 1.442695, %v1408_v50  ;;  %v1409_v24 = vsub.f32 %v2905_v7, %v1379_v27 }
 0x3e3   :  { %1912 = vpow2.f32 %v1424_v16  ;;  %v1426_v9 = vmul.f32 1.442695, %v1409_v24 }
 0x3e5   :  { %1914 = vpow2.f32 %v1426_v9 }
 0x3e9   :  { %v3039_v8 = vpop.eup %1908 }
 0x3ea   :  { %v1389_v58 = vpop.xlane.xlu0 %1388  ;;  %1460 = vadd.xlane.f32.xlu0 %v3039_v8 }
 0x3eb   :  { %v1414_v30 = vsub.f32 %v2929_v48, %v1389_v58  ;;  %v3043_v38 = vpop.eup %1910 }
 0x3ec   :  { %v1391_v33 = vpop.xlane.xlu1 %1390  ;;  %1462 = vadd.xlane.f32.xlu1 %v3043_v38 }
 0x3ed   :  { %v1436_v40 = vmul.f32 1.442695, %v1414_v30  ;;  %v3046_v52 = vpop.eup %1912  ;;  %v1415_v7 = vsub.f32 %v2939_v10, %v1391_v33 }
 0x3ee   :  { %v1385_v45 = vpop.xlane.xlu0 %1384  ;;  %1456 = vadd.xlane.f32.xlu0 %v3046_v52 }
 0x3ef   :  { %1916 = vpow2.f32 %v1436_v40  ;;  %v1412_v39 = vsub.f32 %v2946_v60, %v1385_v45  ;;  %v3051_v14 = vpop.eup %1914  ;;  %v1438_v59 = vmul.f32 1.442695, %v1415_v7 }
 0x3f0   :  { %v1387_v43 = vpop.xlane.xlu1 %1386  ;;  %1458 = vadd.xlane.f32.xlu1 %v3051_v14 }
 0x3f1   :  { %v1432_v48 = vmul.f32 1.442695, %v1412_v39  ;;  %1918 = vpow2.f32 %v1438_v59  ;;  %v1413_v26 = vsub.f32 %v2955_v53, %v1387_v43 }
 0x3f3   :  { %1920 = vpow2.f32 %v1432_v48  ;;  %v1434_v41 = vmul.f32 1.442695, %v1413_v26 }
 0x3f5   :  { %1922 = vpow2.f32 %v1434_v41 }
 0x3f9   :  { %v3055_v10 = vpop.eup %1916 }
 0x3fa   :  { %1468 = vadd.xlane.f32.xlu0 %v3055_v10  ;;  %v1397_v54 = vpop.xlane.xlu0 %1396 }
 0x3fb   :  { %v1418_v60 = vsub.f32 %v2977_v25, %v1397_v54  ;;  %v3059_v46 = vpop.eup %1918 }
 0x3fc   :  { %1470 = vadd.xlane.f32.xlu1 %v3059_v46 }
 0x3fd   :  { %v3061_v47 = vpop.eup %1920  ;;  %v1444_v13 = vmul.f32 1.442695, %v1418_v60  ;;  %v1399_v5 = vpop.xlane.xlu1 %1398 }
 0x3fe   :  { %v1419_v53 = vsub.f32 %v2985_v42, %v1399_v5  ;;  %1464 = vadd.xlane.f32.xlu0 %v3061_v47  ;;  %v1393_v49 = vpop.xlane.xlu0 %1392 }
 0x3ff   :  { %1924 = vpow2.f32 %v1444_v13  ;;  %v1416_v3 = vsub.f32 %v2992_v29, %v1393_v49  ;;  %v3067_v22 = vpop.eup %1922 }
 0x400   :  { %v1446_v31 = vmul.f32 1.442695, %v1419_v53  ;;  %1466 = vadd.xlane.f32.xlu1 %v3067_v22 }
 0x401   :  { %v1440_v25 = vmul.f32 1.442695, %v1416_v3  ;;  %v1395_v17 = vpop.xlane.xlu1 %1394 }
 0x402   :  { %1926 = vpow2.f32 %v1446_v31  ;;  %v1417_v4 = vsub.f32 %v3001_v20, %v1395_v17  ;;  %v1401_v28 = vpop.xlane.xlu0 %1400 }
 0x403   :  { %1928 = vpow2.f32 %v1440_v25  ;;  %v1420_v42 = vsub.f32 %v3010_v44, %v1401_v28 }
 0x404   :  { %v1442_v18 = vmul.f32 1.442695, %v1417_v4 }
 0x405   :  { %v1448_v37 = vmul.f32 1.442695, %v1420_v42  ;;  %v1403_v55 = vpop.xlane.xlu1 %1402 }
 0x406   :  { %1930 = vpow2.f32 %v1442_v18  ;;  %v1421_v29 = vsub.f32 %v3018_v19, %v1403_v55 }
 0x407   :  { %1932 = vpow2.f32 %v1448_v37 }
 0x408   :  { %v1450_v2 = vmul.f32 1.442695, %v1421_v29 }
 0x409   :  { %v3073_v56 = vpop.eup %1924 }
 0x40a   :  { %1934 = vpow2.f32 %v1450_v2  ;;  %1476 = vadd.xlane.f32.xlu0 %v3073_v56  ;;  %v1405_v57 = vpop.xlane.xlu0 %1404 }
 0x40b   :  { %v1422_v20 = vsub.f32 %v3026_v15, %v1405_v57 }
 0x40c   :  { %v3077_v51 = vpop.eup %1926  ;;  %v1407_v61 = vpop.xlane.xlu1 %1406 }
 0x40d   :  { %v3079_v44 = vpop.eup %1928  ;;  %v1452_v35 = vmul.f32 1.442695, %v1422_v20  ;;  %1478 = vadd.xlane.f32.xlu1 %v3077_v51  ;;  %v1423_v19 = vsub.f32 %v3032_v34, %v1407_v61 }
 0x40e   :  { %1472 = vadd.xlane.f32.xlu0 %v3079_v44 }
 0x40f   :  { %1936 = vpow2.f32 %v1452_v35  ;;  %v1454_v21 = vmul.f32 1.442695, %v1423_v19 }
 0x410   :  { %v3084_v62 = vpop.eup %1930 }
 0x411   :  { %v3086_v12 = vpop.eup %1932  ;;  %1938 = vpow2.f32 %v1454_v21  ;;  %1474 = vadd.xlane.f32.xlu1 %v3084_v62 }
 0x412   :  { %1480 = vadd.xlane.f32.xlu0 %v3086_v12 }
 0x414   :  { %v3090_v15 = vpop.eup %1934 }
 0x415   :  { %1482 = vadd.xlane.f32.xlu1 %v3090_v15 }
 0x419   :  { %v3093_v0 = vpop.eup %1936 }
 0x41a   :  { %1484 = vadd.xlane.f32.xlu0 %v3093_v0 }
 0x41b   :  { %v3096_v34 = vpop.eup %1938 }
 0x41c   :  { %1486 = vadd.xlane.f32.xlu1 %v3096_v34 }
 0x477   :  { %v1461_v23 = vpop.xlane.xlu0 %1460 }
 0x478   :  { %1940 = vrcp.f32 %v1461_v23 }
 0x479   :  { %v1463_v32 = vpop.xlane.xlu1 %1462 }
 0x47a   :  { %1942 = vrcp.f32 %v1463_v32 }
 0x47b   :  { %v1457_v11 = vpop.xlane.xlu0 %1456 }
 0x47c   :  { %1944 = vrcp.f32 %v1457_v11 }
 0x47d   :  { %v1459_v6 = vpop.xlane.xlu1 %1458 }
 0x47e   :  { %1946 = vrcp.f32 %v1459_v6 }
 0x482   :  { %v1941_v1 = vpop.eup %1940 }
 0x483   :  { %v1506_v63 = vmul.f32 %v1941_v1, %v3039_v8 }
 0x484   :  { %v1943_v36 = vpop.eup %1942 }
 0x485   :  { %1522 = vst [vmem:[#allocation3 + $0x10] sm:$0xff] %v1506_v63  ;;  %v1507_v50 = vmul.f32 %v1943_v36, %v3043_v38 }
 0x486   :  { %v1945_v27 = vpop.eup %1944 }
 0x487   :  { %v1469_v16 = vpop.xlane.xlu0 %1468  ;;  %1523 = vst [vmem:[#allocation3 + $0x18] sm:$0xff] %v1507_v50  ;;  %v1504_v24 = vmul.f32 %v1945_v27, %v3046_v52 }
 0x488   :  { %1948 = vrcp.f32 %v1469_v16  ;;  %v1947_v9 = vpop.eup %1946 }
 0x489   :  { %1520 = vst [vmem:[#allocation3] sm:$0xff] %v1504_v24  ;;  %v1505_v58 = vmul.f32 %v1947_v9, %v3051_v14  ;;  %v1471_v30 = vpop.xlane.xlu1 %1470 }
 0x48a   :  { %1950 = vrcp.f32 %v1471_v30 }
 0x48b   :  { %v1465_v40 = vpop.xlane.xlu0 %1464  ;;  %1521 = vst [vmem:[#allocation3 + $0x8] sm:$0xff] %v1505_v58 }
 0x48c   :  { %1952 = vrcp.f32 %v1465_v40 }
 0x48d   :  { %v1467_v8 = vpop.xlane.xlu1 %1466 }
 0x48e   :  { %1954 = vrcp.f32 %v1467_v8 }
 0x492   :  { %v1949_v33 = vpop.eup %1948 }
 0x493   :  { %v1510_v38 = vmul.f32 %v1949_v33, %v3055_v10 }
 0x494   :  { %v1951_v7 = vpop.eup %1950 }
 0x495   :  { %1526 = vst [vmem:[#allocation3 + $0x30] sm:$0xff] %v1510_v38  ;;  %v1511_v52 = vmul.f32 %v1951_v7, %v3059_v46 }
 0x496   :  { %v1953_v45 = vpop.eup %1952 }
 0x497   :  { %v1508_v39 = vmul.f32 %v1953_v45, %v3061_v47  ;;  %v1477_v59 = vpop.xlane.xlu0 %1476  ;;  %1527 = vst [vmem:[#allocation3 + $0x38] sm:$0xff] %v1511_v52 }
 0x498   :  { %1956 = vrcp.f32 %v1477_v59  ;;  %v1955_v14 = vpop.eup %1954 }
 0x499   :  { %1524 = vst [vmem:[#allocation3 + $0x20] sm:$0xff] %v1508_v39  ;;  %v1509_v48 = vmul.f32 %v1955_v14, %v3067_v22 }
 0x49a   :  { %v1479_v43 = vpop.xlane.xlu1 %1478 }
 0x49b   :  { %1958 = vrcp.f32 %v1479_v43  ;;  %v1473_v26 = vpop.xlane.xlu0 %1472  ;;  %1525 = vst [vmem:[#allocation3 + $0x28] sm:$0xff] %v1509_v48 }
 0x49c   :  { %1960 = vrcp.f32 %v1473_v26 }
 0x49e   :  { %v1475_v41 = vpop.xlane.xlu1 %1474 }
 0x49f   :  { %1962 = vrcp.f32 %v1475_v41  ;;  %v1481_v10 = vpop.xlane.xlu0 %1480 }
 0x4a0   :  { %1964 = vrcp.f32 %v1481_v10 }
 0x4a2   :  { %v1957_v54 = vpop.eup %1956  ;;  %v1483_v60 = vpop.xlane.xlu1 %1482 }
 0x4a3   :  { %v1514_v46 = vmul.f32 %v1957_v54, %v3073_v56  ;;  %1966 = vrcp.f32 %v1483_v60 }
 0x4a5   :  { %v1959_v47 = vpop.eup %1958  ;;  %1530 = vst [vmem:[#allocation3 + $0x50] sm:$0xff] %v1514_v46 }
 0x4a6   :  { %v1961_v13 = vpop.eup %1960  ;;  %v1515_v5 = vmul.f32 %v1959_v47, %v3077_v51 }
 0x4a7   :  { %v1512_v53 = vmul.f32 %v1961_v13, %v3079_v44  ;;  %v1485_v49 = vpop.xlane.xlu0 %1484 }
 0x4a8   :  { %1531 = vst [vmem:[#allocation3 + $0x58] sm:$0xff] %v1515_v5  ;;  %1968 = vrcp.f32 %v1485_v49 }
 0x4a9   :  { %v1963_v3 = vpop.eup %1962  ;;  %1528 = vst [vmem:[#allocation3 + $0x40] sm:$0xff] %v1512_v53  ;;  %v1487_v22 = vpop.xlane.xlu1 %1486 }
 0x4aa   :  { %v1965_v31 = vpop.eup %1964  ;;  %v1513_v25 = vmul.f32 %v1963_v3, %v3084_v62  ;;  %1970 = vrcp.f32 %v1487_v22 }
 0x4ab   :  { %v1516_v17 = vmul.f32 %v1965_v31, %v3086_v12 }
 0x4ac   :  { %1529 = vst [vmem:[#allocation3 + $0x48] sm:$0xff] %v1513_v25 }
 0x4ad   :  { %v1967_v4 = vpop.eup %1966  ;;  %1532 = vst [vmem:[#allocation3 + $0x60] sm:$0xff] %v1516_v17 }
 0x4ae   :  { %v1517_v28 = vmul.f32 %v1967_v4, %v3090_v15 }
 0x4b0   :  { %1533 = vst [vmem:[#allocation3 + $0x68] sm:$0xff] %v1517_v28 }
 0x4b2   :  { %v1969_v42 = vpop.eup %1968 }
 0x4b3   :  { %v1518_v18 = vmul.f32 %v1969_v42, %v3093_v0 }
 0x4b4   :  { %v1971_v37 = vpop.eup %1970 }
 0x4b5   :  { %1534 = vst [vmem:[#allocation3 + $0x70] sm:$0xff] %v1518_v18  ;;  %v1519_v55 = vmul.f32 %v1971_v37, %v3096_v34 }
 0x4b7   :  { %1535 = vst [vmem:[#allocation3 + $0x78] sm:$0xff] %v1519_v55 }
 0x4b8   :  { %1983 = shalt.err (!%p1980_p4)
}
 0x4b9   :  { %s1984_s24 = scalar_lea.hbm %s3136_s9, 2048 }
 0x4ba   :  { %p1985_p5 = scmp.ne.s32.totalorder %s3136_s9, %s1984_s24  ;;  %p1988_p6 = scmp.lt.u32.totalorder %s1984_s24, %s3136_s9 }
 0x4bc   :  { %p1990_p7 = pnand %p1988_p6, %p1985_p5 }
 0x4be   :  { %1993 = shalt.err (!%p1990_p7)
}
 0x4bf   :  { %s1998_s29 = smov 128   ;;  %s1999_s30 = smov 8  }
 0x4c0   :  { %1547 = dma.vmem_to_hbm [thread:$0]  %s1542_s21, 2048, %s3136_s9, [#allocation4], %s1998_s29, %s1998_s29, %s1999_s30  }
 0x4c1   :  { %1994 = dma.done.wait [#allocation4], 2048  }
 0x4c2   :  { %1995 = vsyncadd [#allocation4], 4294965248 }
 0x4c3   :  { %1551 = vsyncpa [#allocation4], 1 }

</bundles_post_ra>
